<compile_context>
chip_gen: v7x
topology: tpu7x:2x2x1
jax: 0.10.0
libtpu: 0.0.40
codegen_flags: <defaults>
</compile_context>

<pallas_src>
import functools

import jax
import jax.numpy as jnp
from jax.experimental import pallas as pl
from jax.experimental.pallas import tpu as pltpu


def _se_kernel(x_ref, w1t_ref, w2t_ref, o_ref, *, inv_hw):
    # x_ref / o_ref: (Bt, C, HWp); w1t_ref: (C, Cr); w2t_ref: (Cr, C)
    x = x_ref[...]                                              # native dtype

    # Squeeze: spatial sum with f32 accumulation (lane reduce).  Zero-padded
    # lanes contribute nothing; divide by the *unpadded* HW.
    pooled = jnp.sum(x.astype(jnp.float32), axis=-1) * inv_hw   # (Bt, C) f32

    # Excite: fc1 (no bias) + ReLU, fc2 (no bias) + sigmoid.  Tiny MXU
    # matmuls, f32 accumulation — pure filler under the HBM roofline.
    h = jnp.maximum(
        jnp.dot(pooled, w1t_ref[...].astype(jnp.float32),
                preferred_element_type=jnp.float32), 0.0)       # (Bt, Cr)
    gate = jax.nn.sigmoid(
        jnp.dot(h, w2t_ref[...].astype(jnp.float32),
                preferred_element_type=jnp.float32))            # (Bt, C)

    # Scale in the native dtype (no f32 block copy kept live across the pass).
    o_ref[...] = x * gate.astype(o_ref.dtype)[:, :, None]


def _round_up(n, m):
    return ((n + m - 1) // m) * m


def _chip_info():
    """(tensorcores_per_chip, physical VMEM bytes) from the device kind."""
    try:
        kind = jax.devices()[0].device_kind.lower()
    except Exception:
        kind = ""
    if "v7" in kind or "7x" in kind:
        return 2, 64 << 20        # v7x: 2 TCs per chip, 64 MiB VMEM per TC
    if "v4" in kind or "v5p" in kind:
        return 2, 128 << 20       # megacore chips
    if kind:
        return 1, 128 << 20       # v5e / v6e: single TC, 128 MiB VMEM
    return 1, 64 << 20            # unknown backend: be conservative


def _choose_batch_tile(B, per_img_bytes, *, num_cores):
    """Images per block (chip-aware).

    Single-TC chips: one big block (target ~4 MiB, cap 8 MiB) — extra grid
    steps only add per-step overhead.  Multi-TC chips (v7x): cap blocks at
    4 MiB (64 MiB VMEM) and prefer >= num_cores grid steps so every
    TensorCore gets work, as long as blocks stay >= 256 KiB.
    """
    target_block = 4 << 20
    max_block = (8 << 20) if num_cores <= 1 else (4 << 20)
    bt = int(max(1, min(B, target_block // max(per_img_bytes, 1))))
    while bt > 1 and bt * per_img_bytes > max_block:
        bt -= 1
    if num_cores >= 2 and B >= num_cores:
        bt_split = -(-B // num_cores)     # largest bt giving >= num_cores steps
        if bt_split * per_img_bytes >= (256 << 10):
            bt = min(bt, bt_split)
    return bt


def se_layer(x, w1, w2):
    """x: (B, C, H, W); w1: (C//r, C); w2: (C, C//r)  (PyTorch Linear shapes)."""
    B, C, H, W = x.shape
    HW = H * W
    Cr = w1.shape[0]

    num_cores, vmem_cap = _chip_info()

    # Lane-dense layout: flatten spatial onto lanes, zero-pad to mult. of 128.
    HWp = _round_up(HW, 128)
    x_flat = x.reshape(B, C, HW)
    if HWp != HW:
        x_flat = jnp.pad(x_flat, ((0, 0), (0, 0), (0, HWp - HW)))

    per_img_bytes = C * HWp * x.dtype.itemsize
    bt = _choose_batch_tile(B, per_img_bytes, num_cores=num_cores)

    # Pad the batch up to a multiple of the tile (never shrink the block).
    Bp = _round_up(B, bt)
    if Bp != B:
        x_flat = jnp.pad(x_flat, ((0, Bp - B), (0, 0), (0, 0)))

    w1t = jnp.transpose(w1)               # (C, Cr)
    w2t = jnp.transpose(w2)               # (Cr, C)

    grid = (Bp // bt,)
    block_bytes = bt * per_img_bytes
    w_bytes = w1t.size * w1t.dtype.itemsize + w2t.size * w2t.dtype.itemsize
    # Double-buffered in + out blocks, resident weights, plus slack; capped by
    # the chip's physical VMEM (64 MiB on v7x, 128 MiB on v5e/v6e).
    vmem_limit = int(min(vmem_cap - (8 << 20),
                         max(16 << 20, 4 * block_bytes + 4 * w_bytes + (4 << 20))))

    cost = pl.CostEstimate(
        flops=int(2 * Bp * C * HWp + 4 * Bp * C * Cr),
        transcendentals=int(Bp * C),
        bytes_accessed=int(2 * Bp * C * HWp * x.dtype.itemsize + 2 * w_bytes),
    )

    kernel = functools.partial(_se_kernel, inv_hw=1.0 / float(HW))

    out_flat = pl.pallas_call(
        kernel,
        out_shape=jax.ShapeDtypeStruct((Bp, C, HWp), x.dtype),
        grid_spec=pltpu.PrefetchScalarGridSpec(
            num_scalar_prefetch=0,
            grid=grid,
            in_specs=[
                pl.BlockSpec((bt, C, HWp), lambda b: (b, 0, 0)),
                pl.BlockSpec((C, Cr), lambda b: (0, 0)),
                pl.BlockSpec((Cr, C), lambda b: (0, 0)),
            ],
            out_specs=pl.BlockSpec((bt, C, HWp), lambda b: (b, 0, 0)),
        ),
        compiler_params=pltpu.CompilerParams(
            dimension_semantics=("parallel",),
            vmem_limit_bytes=vmem_limit,
        ),
        cost_estimate=cost,
    )(x_flat, w1t, w2t)

    return out_flat[:B, :, :HW].reshape(B, C, H, W)


def se_layer_ref(x, w1, w2):
    """Pure-JAX reference mirroring the PyTorch forward."""
    B, C, H, W = x.shape
    y = jnp.mean(x, axis=(2, 3))                        # (B, C)
    y = jnp.maximum(y @ w1.T, 0.0)                      # (B, C//r)
    y = jax.nn.sigmoid(y @ w2.T)                        # (B, C)
    return x * y.reshape(B, C, 1, 1)


if __name__ == "__main__":
    key = jax.random.PRNGKey(0)
    kx, k1, k2, kx2 = jax.random.split(key, 4)

    # SELayer(channel=64, reduction=16); HW = 256 keeps stores lane-dense.
    B, C, H, W = 8, 64, 16, 16
    reduction = 16
    Cr = C // reduction

    x = jax.random.normal(kx, (B, C, H, W), dtype=jnp.float32)
    # Deterministic synthetic weights (PyTorch Linear shape: out x in).
    w1 = jax.random.normal(k1, (Cr, C), dtype=jnp.float32) * 0.1
    w2 = jax.random.normal(k2, (C, Cr), dtype=jnp.float32) * 0.1

    out = jax.block_until_ready(se_layer(x, w1, w2))
    ref = jax.block_until_ready(se_layer_ref(x, w1, w2))
    assert out.shape == (B, C, H, W)
    assert jnp.allclose(out, ref, atol=1e-4, rtol=1e-4), "mismatch vs reference"

    # Second check: real SE shape with HW = 49 (not a multiple of 128) and an
    # odd batch — exercises the lane-padding path.
    x2 = jax.random.normal(kx2, (3, C, 7, 7), dtype=jnp.float32)
    out2 = jax.block_until_ready(se_layer(x2, w1, w2))
    ref2 = jax.block_until_ready(se_layer_ref(x2, w1, w2))
    assert out2.shape == x2.shape
    assert jnp.allclose(out2, ref2, atol=1e-4, rtol=1e-4), "mismatch (padded HW)"

    print("KERNEL_OK")
</pallas_src>

<mosaic_0001>
module attributes {stable_mosaic.version = 11 : i64} {
  func.func @_se_kernel(%arg0: i32, %arg1: memref<8x64x256xf32, #tpu.memory_space<vmem>>, %arg2: memref<64x4xf32, #tpu.memory_space<vmem>>, %arg3: memref<4x64xf32, #tpu.memory_space<vmem>>, %arg4: memref<8x64x256xf32, #tpu.memory_space<vmem>>) attributes {dimension_semantics = [#tpu.dimension_semantics<parallel>], iteration_bounds = array<i64: 1>, scalar_prefetch = 0 : i64, scratch_operands = 0 : i64, tpu.core_type = #tpu.core_type<tc>, window_params = [{transform_indices = @transform_0, window_bounds = array<i64: 8, 64, 256>}, {pipeline_mode = #tpu.pipeline_mode<synchronous>, transform_indices = @transform_1, window_bounds = array<i64: 64, 4>}, {pipeline_mode = #tpu.pipeline_mode<synchronous>, transform_indices = @transform_2, window_bounds = array<i64: 4, 64>}, {transform_indices = @transform_3, window_bounds = array<i64: 8, 64, 256>}]} {
    %c0 = arith.constant 0 : index
    %c0_0 = arith.constant 0 : index
    %c0_1 = arith.constant 0 : index
    %0 = vector.load %arg1[%c0, %c0_0, %c0_1] : memref<8x64x256xf32, #tpu.memory_space<vmem>>, vector<8x64x256xf32>
    %cst = arith.constant dense<0.000000e+00> : vector<8x64xf32>
    %1 = vector.multi_reduction <add>, %0, %cst [2] : vector<8x64x256xf32> to vector<8x64xf32>
    %cst_2 = arith.constant 3.906250e-03 : f32
    %2 = vector.broadcast %cst_2 : f32 to vector<8x64xf32>
    %3 = arith.mulf %1, %2 : vector<8x64xf32>
    %c0_3 = arith.constant 0 : index
    %c0_4 = arith.constant 0 : index
    %4 = vector.load %arg2[%c0_3, %c0_4] : memref<64x4xf32, #tpu.memory_space<vmem>>, vector<64x4xf32>
    %cst_5 = arith.constant dense<0.000000e+00> : vector<8x4xf32>
    %5 = tpu.matmul %3, %4, %cst_5 {dimension_numbers = #tpu.dot_dimension_numbers<[1], [0], [0], [1], [0, 0, 1, 1], [], []>} : vector<8x64xf32>, vector<64x4xf32>, vector<8x4xf32> -> vector<8x4xf32>
    %cst_6 = arith.constant 0.000000e+00 : f32
    %6 = vector.broadcast %cst_6 : f32 to vector<8x4xf32>
    %7 = arith.maximumf %5, %6 : vector<8x4xf32>
    %c0_7 = arith.constant 0 : index
    %c0_8 = arith.constant 0 : index
    %8 = vector.load %arg3[%c0_7, %c0_8] : memref<4x64xf32, #tpu.memory_space<vmem>>, vector<4x64xf32>
    %cst_9 = arith.constant dense<0.000000e+00> : vector<8x64xf32>
    %9 = tpu.matmul %7, %8, %cst_9 {dimension_numbers = #tpu.dot_dimension_numbers<[1], [0], [0], [1], [0, 0, 1, 1], [], []>} : vector<8x4xf32>, vector<4x64xf32>, vector<8x64xf32> -> vector<8x64xf32>
    %10 = arith.negf %9 : vector<8x64xf32>
    %11 = math.exp %10 : vector<8x64xf32>
    %cst_10 = arith.constant 1.000000e+00 : f32
    %12 = vector.broadcast %cst_10 : f32 to vector<8x64xf32>
    %13 = arith.addf %12, %11 : vector<8x64xf32>
    %14 = arith.divf %12, %13 : vector<8x64xf32>
    %15 = vector.shape_cast %14 : vector<8x64xf32> to vector<8x64x1xf32>
    %16 = vector.broadcast %15 : vector<8x64x1xf32> to vector<8x64x256xf32>
    %17 = arith.mulf %0, %16 : vector<8x64x256xf32>
    %c0_11 = arith.constant 0 : index
    %c0_12 = arith.constant 0 : index
    %c0_13 = arith.constant 0 : index
    %18 = vector.load %arg4[%c0_11, %c0_12, %c0_13] : memref<8x64x256xf32, #tpu.memory_space<vmem>>, vector<8x64x256xf32>
    tpu.vector_store %arg4[%c0_11, %c0_12, %c0_13], %17 {strides = array<i32>} : memref<8x64x256xf32, #tpu.memory_space<vmem>>, vector<8x64x256xf32>,
    return
  }
  func.func @transform_0(%arg0: i32) -> (i32, i32, i32) {
    %c0_i32 = arith.constant 0 : i32
    %c0_i32_0 = arith.constant 0 : i32
    %c0_i32_1 = arith.constant 0 : i32
    return %arg0, %c0_i32, %c0_i32_0 : i32, i32, i32
  }
  func.func @transform_1(%arg0: i32) -> (i32, i32) {
    %c0_i32 = arith.constant 0 : i32
    %c0_i32_0 = arith.constant 0 : i32
    %c0_i32_1 = arith.constant 0 : i32
    return %c0_i32, %c0_i32_0 : i32, i32
  }
  func.func @transform_2(%arg0: i32) -> (i32, i32) {
    %c0_i32 = arith.constant 0 : i32
    %c0_i32_0 = arith.constant 0 : i32
    %c0_i32_1 = arith.constant 0 : i32
    return %c0_i32, %c0_i32_0 : i32, i32
  }
  func.func @transform_3(%arg0: i32) -> (i32, i32, i32) {
    %c0_i32 = arith.constant 0 : i32
    %c0_i32_0 = arith.constant 0 : i32
    %c0_i32_1 = arith.constant 0 : i32
    return %arg0, %c0_i32, %c0_i32_0 : i32, i32, i32
  }
}

</mosaic_0001>

<bundles_post_ra>
// kernel: tpu_custom_call.1
= control target key start
LH: loop header
LB: loop body
LE: loop exit
PB: predicated region body
PF: predicated region fallthrough
CT: control target
= control target key end

     0   :  { %8 = vsyncpa [#allocation3], 0  ;;  %s2160_s0 = inlined_call_operand.hbm [shape: f32[8,64,256], index: 0, kind: input, shape index: {}]   ;;  %s2161_s1 = inlined_call_operand.vmem [shape: f32[64,4], index: 1, kind: input, shape index: {}]   ;;  %s2162_s2 = inlined_call_operand.vmem [shape: f32[4,64], index: 2, kind: input, shape index: {}]   ;;  %s2163_s3 = inlined_call_operand.hbm [shape: f32[8,64,256], index: 3, kind: output, shape index: {}]  }
   0x1   :  { %9 = vsyncpa [#allocation4], 0  ;;  %s1777_s12 = smov [#allocation2]   ;;  %s1729_s16 = scalar_lea.hbm %s2160_s0, 16384 }
   0x2   :  { %s15_s13 = sshll.u32 %s1777_s12, 4  ;;  %p1730_p0 = scmp.ne.s32.totalorder %s2160_s0, %s1729_s16  ;;  %s16_s13 = int_to_ptr.vmem [resolvable:$true] %s15_s13 }
   0x3   :  { %p1733_p1 = scmp.lt.u32.totalorder %s1729_s16, %s2160_s0 }
   0x5   :  { %p1735_p2 = pnand %p1733_p1, %p1730_p0 }
   0x7   :  { %1738 = shalt.err (!%p1735_p2)
}
   0x8   :  { %s1739_s21 = scalar_lea.vmem %s16_s13, 16384  ;;  %p1744_p4 = scmp.lt.s32.totalorder %s16_s13, %s16_s13 }
   0x9   :  { %p1740_p3 = scmp.ne.s32.totalorder %s16_s13, %s1739_s21  ;;  %p1745_p5 = scmp.lt.s32.totalorder %s1739_s21, %s1739_s21 }
   0xb   :  { %p1746_p6 = por %p1745_p5, %p1744_p4 }
   0xd   :  { %p1747_p7 = pnand %p1746_p6, %p1740_p3 }
   0xf   :  { %1750 = shalt.err (!%p1747_p7)
}
  0x10   :  { %s1778_s22 = smov 256   ;;  %s1779_s23 = smov 16  }
  0x11   :  { %21 = dma.hbm_to_vmem [thread:$0]  %s2160_s0, 16384, %s16_s13, [#allocation3], %s1778_s22, %s1778_s22, %s1779_s23  }
  0x12   :  { %1773 = dma.done.wait [#allocation3], 16384  }
  0x13   :  { %1774 = vsyncadd [#allocation3], 4294950912  ;;  %v45_v0 = vld [vmem:[#allocation2 + $0x80] sm:$0xff]  ;;  %v46_v1 = vld [vmem:[#allocation2 + $0x88] sm:$0xff]  ;;  %vm1781_vm0 = vmmov 0   ;;  %vm496_vm1 = vcmask 130112  }
  0x14   :  { %v29_v2 = vld [vmem:[#allocation2] sm:$0xff]  ;;  %v181_v3 = vadd.f32 %v46_v1, %v45_v0  ;;  %v30_v4 = vld [vmem:[#allocation2 + $0x8] sm:$0xff]  ;;  %v47_v5 = vld [vmem:[#allocation2 + $0x90] sm:$0xff]  ;;  %vm503_vm2 = vcmask 195712   ;;  %vm510_vm3 = vcmask 261312   ;;  %vm517_vm4 = vcmask 326912  }
  0x15   :  { %v48_v6 = vld [vmem:[#allocation2 + $0x98] sm:$0xff]  ;;  %v157_v7 = vadd.f32 %v30_v4, %v29_v2  ;;  %v31_v8 = vld [vmem:[#allocation2 + $0x10] sm:$0xff]  ;;  %v49_v12 = vld [vmem:[#allocation2 + $0xa0] sm:$0xff]  ;;  %vm524_vm5 = vcmask 392512   ;;  %vm531_vm6 = vcmask 458112   ;;  %vm538_vm7 = vcmask 523712  }
  0x16   :  { %v32_v9 = vld [vmem:[#allocation2 + $0x18] sm:$0xff]  ;;  %182 = vadd.xlane.f32.xlu1 %v181_v3  ;;  %v184_v10 = vadd.f32 %v48_v6, %v47_v5  ;;  %v50_v13 = vld [vmem:[#allocation2 + $0xa8] sm:$0xff]  ;;  %v33_v14 = vld [vmem:[#allocation2 + $0x20] sm:$0xff]  ;;  %vm813_vm8 = vcmask 1041409   ;;  %vm815_vm9 = vcmask 1042434   ;;  %vm817_vm10 = vcmask 1043459  }
  0x17   :  { %158 = vadd.xlane.f32.xlu0 %v157_v7  ;;  %v160_v11 = vadd.f32 %v32_v9, %v31_v8  ;;  %v34_v15 = vld [vmem:[#allocation2 + $0x28] sm:$0xff]  ;;  %v187_v16 = vadd.f32 %v50_v13, %v49_v12  ;;  %v63_v18 = vld [vmem:[#allocation2 + $0x110] sm:$0xff]  ;;  %v64_v19 = vld [vmem:[#allocation2 + $0x118] sm:$0xff]  ;;  %vm819_vm11 = vcmask 1044484   ;;  %vm821_vm12 = vcmask 1045509  }
  0x18   :  { %v163_v17 = vadd.f32 %v34_v15, %v33_v14  ;;  %v61_v20 = vld [vmem:[#allocation2 + $0x100] sm:$0xff]  ;;  %v62_v21 = vld [vmem:[#allocation2 + $0x108] sm:$0xff]  ;;  %v208_v22 = vadd.f32 %v64_v19, %v63_v18  ;;  %v51_v24 = vld [vmem:[#allocation2 + $0xb0] sm:$0xff]  ;;  %vm823_vm13 = vcmask 1046534   ;;  %vm825_vm14 = vcmask 1047559  }
  0x19   :  { %v205_v23 = vadd.f32 %v62_v21, %v61_v20  ;;  %v52_v25 = vld [vmem:[#allocation2 + $0xb8] sm:$0xff]  ;;  %v35_v26 = vld [vmem:[#allocation2 + $0x30] sm:$0xff]  ;;  %v77_v30 = vld [vmem:[#allocation2 + $0x180] sm:$0xff]  ;;  %vm827_vm15 = vcmask 523264  }
  0x1a   :  { %185 = vadd.xlane.f32.xlu1 %v184_v10  ;;  %v36_v27 = vld [vmem:[#allocation2 + $0x38] sm:$0xff]  ;;  %v190_v28 = vadd.f32 %v52_v25, %v51_v24  ;;  %v78_v31 = vld [vmem:[#allocation2 + $0x188] sm:$0xff]  ;;  %v65_v32 = vld [vmem:[#allocation2 + $0x120] sm:$0xff] }
  0x1b   :  { %161 = vadd.xlane.f32.xlu0 %v160_v11  ;;  %v166_v29 = vadd.f32 %v36_v27, %v35_v26  ;;  %v66_v33 = vld [vmem:[#allocation2 + $0x128] sm:$0xff]  ;;  %v229_v34 = vadd.f32 %v78_v31, %v77_v30  ;;  %v37_v36 = vld [vmem:[#allocation2 + $0x40] sm:$0xff]  ;;  %v79_v38 = vld [vmem:[#allocation2 + $0x190] sm:$0xff] }
  0x1c   :  { %v211_v35 = vadd.f32 %v66_v33, %v65_v32  ;;  %v38_v37 = vld [vmem:[#allocation2 + $0x48] sm:$0xff]  ;;  %v80_v39 = vld [vmem:[#allocation2 + $0x198] sm:$0xff]  ;;  %v67_v42 = vld [vmem:[#allocation2 + $0x130] sm:$0xff] }
  0x1d   :  { %v169_v40 = vadd.f32 %v38_v37, %v37_v36  ;;  %v232_v41 = vadd.f32 %v80_v39, %v79_v38  ;;  %v68_v43 = vld [vmem:[#allocation2 + $0x138] sm:$0xff]  ;;  %v53_v44 = vld [vmem:[#allocation2 + $0xc0] sm:$0xff]  ;;  %v54_v45 = vld [vmem:[#allocation2 + $0xc8] sm:$0xff] }
  0x1e   :  { %188 = vadd.xlane.f32.xlu1 %v187_v16  ;;  %v214_v46 = vadd.f32 %v68_v43, %v67_v42  ;;  %v193_v47 = vadd.f32 %v54_v45, %v53_v44  ;;  %v93_v48 = vld [vmem:[#allocation2 + $0x200] sm:$0xff]  ;;  %v94_v49 = vld [vmem:[#allocation2 + $0x208] sm:$0xff]  ;;  %v39_v54 = vld [vmem:[#allocation2 + $0x50] sm:$0xff] }
  0x1f   :  { %164 = vadd.xlane.f32.xlu0 %v163_v17  ;;  %v81_v50 = vld [vmem:[#allocation2 + $0x1a0] sm:$0xff]  ;;  %v82_v51 = vld [vmem:[#allocation2 + $0x1a8] sm:$0xff]  ;;  %v253_v52 = vadd.f32 %v94_v49, %v93_v48  ;;  %v40_v55 = vld [vmem:[#allocation2 + $0x58] sm:$0xff] }
  0x20   :  { %v235_v53 = vadd.f32 %v82_v51, %v81_v50  ;;  %v95_v56 = vld [vmem:[#allocation2 + $0x210] sm:$0xff]  ;;  %v96_v57 = vld [vmem:[#allocation2 + $0x218] sm:$0xff]  ;;  %v172_v58 = vadd.f32 %v40_v55, %v39_v54  ;;  %v69_v60 = vld [vmem:[#allocation2 + $0x140] sm:$0xff] }
  0x21   :  { %v256_v59 = vadd.f32 %v96_v57, %v95_v56  ;;  %v70_v61 = vld [vmem:[#allocation2 + $0x148] sm:$0xff]  ;;  %v55_v62 = vld [vmem:[#allocation2 + $0xd0] sm:$0xff]  ;;  %v56_v63 = vld [vmem:[#allocation2 + $0xd8] sm:$0xff] }
  0x22   :  { %209 = vadd.xlane.f32.xlu1 %v208_v22  ;;  %v217_v0 = vadd.f32 %v70_v61, %v69_v60  ;;  %v196_v1 = vadd.f32 %v56_v63, %v55_v62  ;;  %v97_v2 = vld [vmem:[#allocation2 + $0x220] sm:$0xff]  ;;  %v98_v3 = vld [vmem:[#allocation2 + $0x228] sm:$0xff]  ;;  %v83_v4 = vld [vmem:[#allocation2 + $0x1b0] sm:$0xff] }
  0x23   :  { %206 = vadd.xlane.f32.xlu0 %v205_v23  ;;  %v84_v5 = vld [vmem:[#allocation2 + $0x1b8] sm:$0xff]  ;;  %v259_v6 = vadd.f32 %v98_v3, %v97_v2  ;;  %v111_v8 = vld [vmem:[#allocation2 + $0x290] sm:$0xff]  ;;  %v109_v10 = vld [vmem:[#allocation2 + $0x280] sm:$0xff] }
  0x24   :  { %v238_v7 = vadd.f32 %v84_v5, %v83_v4  ;;  %v112_v9 = vld [vmem:[#allocation2 + $0x298] sm:$0xff]  ;;  %v110_v11 = vld [vmem:[#allocation2 + $0x288] sm:$0xff]  ;;  %v57_v14 = vld [vmem:[#allocation2 + $0xe0] sm:$0xff] }
  0x25   :  { %v280_v12 = vadd.f32 %v112_v9, %v111_v8  ;;  %v277_v13 = vadd.f32 %v110_v11, %v109_v10  ;;  %v58_v15 = vld [vmem:[#allocation2 + $0xe8] sm:$0xff]  ;;  %v41_v16 = vld [vmem:[#allocation2 + $0x60] sm:$0xff]  ;;  %v71_v22 = vld [vmem:[#allocation2 + $0x150] sm:$0xff] }
  0x26   :  { %191 = vadd.xlane.f32.xlu1 %v190_v28  ;;  %v42_v17 = vld [vmem:[#allocation2 + $0x68] sm:$0xff]  ;;  %v199_v18 = vadd.f32 %v58_v15, %v57_v14  ;;  %v85_v20 = vld [vmem:[#allocation2 + $0x1c0] sm:$0xff]  ;;  %v72_v23 = vld [vmem:[#allocation2 + $0x158] sm:$0xff] }
  0x27   :  { %167 = vadd.xlane.f32.xlu0 %v166_v29  ;;  %v175_v19 = vadd.f32 %v42_v17, %v41_v16  ;;  %v86_v21 = vld [vmem:[#allocation2 + $0x1c8] sm:$0xff]  ;;  %v220_v25 = vadd.f32 %v72_v23, %v71_v22  ;;  %v113_v26 = vld [vmem:[#allocation2 + $0x2a0] sm:$0xff]  ;;  %v99_v28 = vld [vmem:[#allocation2 + $0x230] sm:$0xff] }
  0x28   :  { %v241_v24 = vadd.f32 %v86_v21, %v85_v20  ;;  %v114_v27 = vld [vmem:[#allocation2 + $0x2a8] sm:$0xff]  ;;  %v100_v29 = vld [vmem:[#allocation2 + $0x238] sm:$0xff]  ;;  %v127_v32 = vld [vmem:[#allocation2 + $0x310] sm:$0xff] }
  0x29   :  { %v283_v30 = vadd.f32 %v114_v27, %v113_v26  ;;  %v262_v31 = vadd.f32 %v100_v29, %v99_v28  ;;  %v128_v33 = vld [vmem:[#allocation2 + $0x318] sm:$0xff]  ;;  %v59_v38 = vld [vmem:[#allocation2 + $0xf0] sm:$0xff]  ;;  %v141_v56 = vld [vmem:[#allocation2 + $0x380] sm:$0xff] }
  0x2a   :  { %230 = vadd.xlane.f32.xlu1 %v229_v34  ;;  %v125_v34 = vld [vmem:[#allocation2 + $0x300] sm:$0xff]  ;;  %v304_v36 = vadd.f32 %v128_v33, %v127_v32  ;;  %v60_v39 = vld [vmem:[#allocation2 + $0xf8] sm:$0xff]  ;;  %v87_v44 = vld [vmem:[#allocation2 + $0x1d0] sm:$0xff] }
  0x2b   :  { %212 = vadd.xlane.f32.xlu0 %v211_v35  ;;  %v126_v35 = vld [vmem:[#allocation2 + $0x308] sm:$0xff]  ;;  %v202_v42 = vadd.f32 %v60_v39, %v59_v38  ;;  %v88_v45 = vld [vmem:[#allocation2 + $0x1d8] sm:$0xff]  ;;  %v115_v50 = vld [vmem:[#allocation2 + $0x2b0] sm:$0xff] }
  0x2c   :  { %v301_v37 = vadd.f32 %v126_v35, %v125_v34  ;;  %v244_v48 = vadd.f32 %v88_v45, %v87_v44  ;;  %v116_v51 = vld [vmem:[#allocation2 + $0x2b8] sm:$0xff]  ;;  %v142_v57 = vld [vmem:[#allocation2 + $0x388] sm:$0xff]  ;;  %v75_v62 = vld [vmem:[#allocation2 + $0x170] sm:$0xff] }
  0x2d   :  { %v286_v54 = vadd.f32 %v116_v51, %v115_v50  ;;  %v325_v60 = vadd.f32 %v142_v57, %v141_v56  ;;  %v76_v63 = vld [vmem:[#allocation2 + $0x178] sm:$0xff]  ;;  %v103_v4 = vld [vmem:[#allocation2 + $0x250] sm:$0xff]  ;;  %v121_v34 = vld [vmem:[#allocation2 + $0x2e0] sm:$0xff] }
  0x2e   :  { %170 = vadd.xlane.f32.xlu1 %v169_v40  ;;  %v43_v40 = vld [vmem:[#allocation2 + $0x70] sm:$0xff]  ;;  %v226_v2 = vadd.f32 %v76_v63, %v75_v62  ;;  %v104_v5 = vld [vmem:[#allocation2 + $0x258] sm:$0xff]  ;;  %v122_v35 = vld [vmem:[#allocation2 + $0x2e8] sm:$0xff] }
  0x2f   :  { %233 = vadd.xlane.f32.xlu0 %v232_v41  ;;  %v44_v41 = vld [vmem:[#allocation2 + $0x78] sm:$0xff]  ;;  %v268_v8 = vadd.f32 %v104_v5, %v103_v4  ;;  %v131_v10 = vld [vmem:[#allocation2 + $0x330] sm:$0xff]  ;;  %v295_v38 = vadd.f32 %v122_v35, %v121_v34 }
  0x30   :  { %v178_v43 = vadd.f32 %v44_v41, %v43_v40  ;;  %v132_v11 = vld [vmem:[#allocation2 + $0x338] sm:$0xff]  ;;  %v91_v16 = vld [vmem:[#allocation2 + $0x1f0] sm:$0xff]  ;;  %v149_v40 = vld [vmem:[#allocation2 + $0x3c0] sm:$0xff] }
  0x31   :  { %v310_v14 = vadd.f32 %v132_v11, %v131_v10  ;;  %v92_v17 = vld [vmem:[#allocation2 + $0x1f8] sm:$0xff]  ;;  %v119_v22 = vld [vmem:[#allocation2 + $0x2d0] sm:$0xff]  ;;  %v150_v41 = vld [vmem:[#allocation2 + $0x3c8] sm:$0xff] }
  0x32   :  { %215 = vadd.xlane.f32.xlu1 %v214_v46  ;;  %v73_v46 = vld [vmem:[#allocation2 + $0x160] sm:$0xff]  ;;  %v250_v20 = vadd.f32 %v92_v17, %v91_v16  ;;  %v120_v23 = vld [vmem:[#allocation2 + $0x2d8] sm:$0xff]  ;;  %v147_v28 = vld [vmem:[#allocation2 + $0x3b0] sm:$0xff]  ;;  %v337_v44 = vadd.f32 %v150_v41, %v149_v40 }
  0x33   :  { %194 = vadd.xlane.f32.xlu0 %v193_v47  ;;  %v74_v47 = vld [vmem:[#allocation2 + $0x168] sm:$0xff]  ;;  %v292_v26 = vadd.f32 %v120_v23, %v119_v22  ;;  %v148_v29 = vld [vmem:[#allocation2 + $0x3b8] sm:$0xff]  ;;  %v415_v4 = vld [vmem:[%s2161_s1 + $0x10] sm:$0xff] }
  0x34   :  { %v223_v49 = vadd.f32 %v74_v47, %v73_v46  ;;  %v334_v32 = vadd.f32 %v148_v29, %v147_v28  ;;  %v137_v46 = vld [vmem:[#allocation2 + $0x360] sm:$0xff]  ;;  %v138_v47 = vld [vmem:[#allocation2 + $0x368] sm:$0xff]  ;;  %v416_v5 = vld [vmem:[%s2161_s1 + $0x18] sm:$0xff] }
  0x35   :  { %v319_v50 = vadd.f32 %v138_v47, %v137_v46  ;;  %v419_v10 = vld [vmem:[%s2161_s1 + $0x30] sm:$0xff]  ;;  %v420_v11 = vld [vmem:[%s2161_s1 + $0x38] sm:$0xff] }
  0x36   :  { %254 = vadd.xlane.f32.xlu1 %v253_v52  ;;  %v101_v52 = vld [vmem:[#allocation2 + $0x240] sm:$0xff] }
  0x37   :  { %236 = vadd.xlane.f32.xlu0 %v235_v53  ;;  %v102_v53 = vld [vmem:[#allocation2 + $0x248] sm:$0xff] }
  0x38   :  { %v265_v55 = vadd.f32 %v102_v53, %v101_v52  ;;  %v139_v52 = vld [vmem:[#allocation2 + $0x370] sm:$0xff]  ;;  %v140_v53 = vld [vmem:[#allocation2 + $0x378] sm:$0xff] }
  0x39   :  { %v322_v56 = vadd.f32 %v140_v53, %v139_v52 }
  0x3a   :  { %173 = vadd.xlane.f32.xlu1 %v172_v58  ;;  %v129_v58 = vld [vmem:[#allocation2 + $0x320] sm:$0xff] }
  0x3b   :  { %257 = vadd.xlane.f32.xlu0 %v256_v59  ;;  %v130_v59 = vld [vmem:[#allocation2 + $0x328] sm:$0xff] }
  0x3c   :  { %v307_v61 = vadd.f32 %v130_v59, %v129_v58  ;;  %v155_v58 = vld [vmem:[#allocation2 + $0x3f0] sm:$0xff]  ;;  %v156_v59 = vld [vmem:[#allocation2 + $0x3f8] sm:$0xff] }
  0x3d   :  { %v346_v62 = vadd.f32 %v156_v59, %v155_v58 }
  0x3e   :  { %218 = vadd.xlane.f32.xlu1 %v217_v0  ;;  %v143_v0 = vld [vmem:[#allocation2 + $0x390] sm:$0xff] }
  0x3f   :  { %197 = vadd.xlane.f32.xlu0 %v196_v1  ;;  %v144_v1 = vld [vmem:[#allocation2 + $0x398] sm:$0xff] }
  0x40   :  { %v328_v3 = vadd.f32 %v144_v1, %v143_v0  ;;  %v413_v0 = vld [vmem:[%s2161_s1] sm:$0xff]  ;;  %v414_v1 = vld [vmem:[%s2161_s1 + $0x8] sm:$0xff] }
  0x42   :  { %260 = vadd.xlane.f32.xlu1 %v259_v6  ;;  %v89_v6 = vld [vmem:[#allocation2 + $0x1e0] sm:$0xff] }
  0x43   :  { %239 = vadd.xlane.f32.xlu0 %v238_v7  ;;  %v90_v7 = vld [vmem:[#allocation2 + $0x1e8] sm:$0xff] }
  0x44   :  { %v247_v9 = vadd.f32 %v90_v7, %v89_v6  ;;  %v1582_v6 = vpack.c.bf16 %v416_v5, %v415_v4  ;;  %v417_v7 = vld [vmem:[%s2161_s1 + $0x20] sm:$0xff] }
  0x46   :  { %281 = vadd.xlane.f32.xlu1 %v280_v12  ;;  %v117_v12 = vld [vmem:[#allocation2 + $0x2c0] sm:$0xff] }
  0x47   :  { %278 = vadd.xlane.f32.xlu0 %v277_v13  ;;  %v118_v13 = vld [vmem:[#allocation2 + $0x2c8] sm:$0xff] }
  0x48   :  { %v289_v15 = vadd.f32 %v118_v13, %v117_v12  ;;  %v1588_v13 = vpack.c.bf16 %v420_v11, %v419_v10 }
  0x4a   :  { %200 = vadd.xlane.f32.xlu1 %v199_v18  ;;  %v145_v18 = vld [vmem:[#allocation2 + $0x3a0] sm:$0xff] }
  0x4b   :  { %176 = vadd.xlane.f32.xlu0 %v175_v19  ;;  %v146_v19 = vld [vmem:[#allocation2 + $0x3a8] sm:$0xff] }
  0x4c   :  { %v331_v21 = vadd.f32 %v146_v19, %v145_v18 }
  0x4e   :  { %242 = vadd.xlane.f32.xlu1 %v241_v24  ;;  %v105_v24 = vld [vmem:[#allocation2 + $0x260] sm:$0xff] }
  0x4f   :  { %221 = vadd.xlane.f32.xlu0 %v220_v25  ;;  %v106_v25 = vld [vmem:[#allocation2 + $0x268] sm:$0xff] }
  0x50   :  { %v271_v27 = vadd.f32 %v106_v25, %v105_v24 }
  0x52   :  { %284 = vadd.xlane.f32.xlu1 %v283_v30  ;;  %v133_v30 = vld [vmem:[#allocation2 + $0x340] sm:$0xff] }
  0x53   :  { %263 = vadd.xlane.f32.xlu0 %v262_v31  ;;  %v134_v31 = vld [vmem:[#allocation2 + $0x348] sm:$0xff] }
  0x54   :  { %v313_v33 = vadd.f32 %v134_v31, %v133_v30 }
  0x56   :  { %305 = vadd.xlane.f32.xlu1 %v304_v36  ;;  %v107_v36 = vld [vmem:[#allocation2 + $0x270] sm:$0xff] }
  0x57   :  { %302 = vadd.xlane.f32.xlu0 %v301_v37  ;;  %v108_v37 = vld [vmem:[#allocation2 + $0x278] sm:$0xff] }
  0x58   :  { %v274_v39 = vadd.f32 %v108_v37, %v107_v36 }
  0x5a   :  { %203 = vadd.xlane.f32.xlu1 %v202_v42  ;;  %v135_v42 = vld [vmem:[#allocation2 + $0x350] sm:$0xff] }
  0x5b   :  { %179 = vadd.xlane.f32.xlu0 %v178_v43  ;;  %v136_v43 = vld [vmem:[#allocation2 + $0x358] sm:$0xff] }
  0x5c   :  { %v316_v45 = vadd.f32 %v136_v43, %v135_v42 }
  0x5e   :  { %245 = vadd.xlane.f32.xlu1 %v244_v48  ;;  %v123_v48 = vld [vmem:[#allocation2 + $0x2f0] sm:$0xff] }
  0x5f   :  { %224 = vadd.xlane.f32.xlu0 %v223_v49  ;;  %v124_v49 = vld [vmem:[#allocation2 + $0x2f8] sm:$0xff] }
  0x60   :  { %v298_v51 = vadd.f32 %v124_v49, %v123_v48 }
  0x62   :  { %287 = vadd.xlane.f32.xlu1 %v286_v54  ;;  %v151_v54 = vld [vmem:[#allocation2 + $0x3d0] sm:$0xff] }
  0x63   :  { %266 = vadd.xlane.f32.xlu0 %v265_v55  ;;  %v152_v55 = vld [vmem:[#allocation2 + $0x3d8] sm:$0xff] }
  0x64   :  { %v340_v57 = vadd.f32 %v152_v55, %v151_v54 }
  0x66   :  { %326 = vadd.xlane.f32.xlu1 %v325_v60  ;;  %v153_v60 = vld [vmem:[#allocation2 + $0x3e0] sm:$0xff] }
  0x67   :  { %308 = vadd.xlane.f32.xlu0 %v307_v61  ;;  %v154_v61 = vld [vmem:[#allocation2 + $0x3e8] sm:$0xff] }
  0x68   :  { %v343_v63 = vadd.f32 %v154_v61, %v153_v60 }
  0x6a   :  { %227 = vadd.xlane.f32.xlu1 %v226_v2  ;;  %v1579_v2 = vpack.c.bf16 %v414_v1, %v413_v0 }
  0x6b   :  { %329 = vadd.xlane.f32.xlu0 %v328_v3  ;;  %v1780_v3 = vmov 0.0|0.0  }
  0x6c   :  { %1578 = vmatprep.subr.bf16.mxu0 %v1780_v3 }
  0x6d   :  { %1580 = vmatpush3.bf16.msra.mxu0 %v1579_v2 }
  0x6e   :  { %269 = vadd.xlane.f32.xlu1 %v268_v8  ;;  %1581 = vmatprep.subr.bf16.mxu0 %v1780_v3  ;;  %v418_v8 = vld [vmem:[%s2161_s1 + $0x28] sm:$0xff] }
  0x6f   :  { %248 = vadd.xlane.f32.xlu0 %v247_v9  ;;  %v1585_v9 = vpack.c.bf16 %v418_v8, %v417_v7 }
  0x71   :  { %1583 = vmatpush3.bf16.msra.mxu0 %v1582_v6 }
  0x72   :  { %311 = vadd.xlane.f32.xlu1 %v310_v14  ;;  %1584 = vmatprep.subr.bf16.mxu0 %v1780_v3 }
  0x73   :  { %290 = vadd.xlane.f32.xlu0 %v289_v15  ;;  %v1782_v15 = vmov 0.0  }
  0x74   :  { %1570 = vmatprep.mubr.msk.f32.mxu0 %vm1781_vm0, %v1782_v15  ;;  %1573 = vmatprep.subr.mxu1 %v1782_v15 }
  0x75   :  { %1586 = vmatpush3.bf16.msra.mxu0 %v1585_v9  ;;  %1575 = vmatprep.mubr.msk.f32.mxu1 %vm1781_vm0, %v1782_v15  ;;  %vm906_vm0 = vcmask 1043456  }
  0x76   :  { %251 = vadd.xlane.f32.xlu1 %v250_v20  ;;  %1587 = vmatprep.subr.bf16.mxu0 %v1780_v3 }
  0x77   :  { %332 = vadd.xlane.f32.xlu0 %v331_v21 }
  0x79   :  { %1589 = vmatpush3.bf16.msra.mxu0 %v1588_v13 }
  0x7a   :  { %293 = vadd.xlane.f32.xlu1 %v292_v26 }
  0x7b   :  { %272 = vadd.xlane.f32.xlu0 %v271_v27 }
  0x7e   :  { %335 = vadd.xlane.f32.xlu1 %v334_v32 }
  0x7f   :  { %314 = vadd.xlane.f32.xlu0 %v313_v33 }
  0x82   :  { %296 = vadd.xlane.f32.xlu1 %v295_v38 }
  0x83   :  { %275 = vadd.xlane.f32.xlu0 %v274_v39 }
  0x86   :  { %338 = vadd.xlane.f32.xlu1 %v337_v44 }
  0x87   :  { %317 = vadd.xlane.f32.xlu0 %v316_v45 }
  0x8a   :  { %320 = vadd.xlane.f32.xlu1 %v319_v50  ;;  %v485_v50 = vlaneseq }
  0x8b   :  { %299 = vadd.xlane.f32.xlu0 %v298_v51 }
  0x8c   :  { %v486_v53 = vand.u32 127, %v485_v50  ;;  %v1899_v54 = vshrl.u32 %v485_v50, 7 }
  0x8e   :  { %323 = vadd.xlane.f32.xlu1 %v322_v56  ;;  %v491_v55 = vadd.s32 4294967288, %v486_v53  ;;  %v498_v56 = vadd.s32 4294967280, %v486_v53  ;;  %v505_v58 = vadd.s32 4294967272, %v486_v53  ;;  %v512_v60 = vadd.s32 4294967264, %v486_v53 }
  0x8f   :  { %341 = vadd.xlane.f32.xlu0 %v340_v57  ;;  %v1906_v61 = vsub.s32 %v486_v53, %v1899_v54  ;;  %v519_v15 = vadd.s32 4294967256, %v486_v53 }
  0x90   :  { %v1912_v0 = vsub.s32 %v498_v56, %v1899_v54  ;;  %v1917_v5 = vsub.s32 %v505_v58, %v1899_v54  ;;  %v1922_v9 = vsub.s32 %v512_v60, %v1899_v54 }
  0x92   :  { %347 = vadd.xlane.f32.xlu1 %v346_v62 }
  0x93   :  { %344 = vadd.xlane.f32.xlu0 %v343_v63  ;;  %v1909_v63 = vsub.s32 %v491_v55, %v1899_v54 }
  0xa3   :  { %v183_v12 = vpop.xlane.xlu1 %182 }
  0xa4   :  { %v159_v14 = vpop.xlane.xlu0 %158  ;;  %v357_v62 = vmul.f32 0.00390625, %v183_v12 }
  0xa5   :  { %v349_v2 = vmul.f32 0.00390625, %v159_v14 }
  0xa6   :  { %v543_v14 = vrot.slane %v357_v62, %v1906_v61 }
  0xa7   :  { %v186_v16 = vpop.xlane.xlu1 %185  ;;  %v490_v55 = vrot.slane %v349_v2, %v1906_v61 }
  0xa8   :  { %v162_v17 = vpop.xlane.xlu0 %161  ;;  %v358_v3 = vmul.f32 0.00390625, %v186_v16  ;;  %v526_v16 = vadd.s32 4294967248, %v486_v53 }
  0xa9   :  { %v350_v4 = vmul.f32 0.00390625, %v162_v17  ;;  %v533_v17 = vadd.s32 4294967240, %v486_v53 }
  0xab   :  { %v189_v18 = vpop.xlane.xlu1 %188 }
  0xac   :  { %v165_v19 = vpop.xlane.xlu0 %164  ;;  %v359_v7 = vmul.f32 0.00390625, %v189_v18  ;;  %v547_v18 = vrot.slane %v358_v3, %v1909_v63  ;;  %v1943_v3 = vsub.s32 %v519_v15, %v1899_v54 }
  0xad   :  { %v351_v8 = vmul.f32 0.00390625, %v165_v19  ;;  %v495_v19 = vrot.slane %v350_v4, %v1909_v63  ;;  %v1946_v4 = vsub.s32 %v526_v16, %v1899_v54 }
  0xaf   :  { %v210_v20 = vpop.xlane.xlu1 %209 }
  0xb0   :  { %v207_v21 = vpop.xlane.xlu0 %206  ;;  %v366_v10 = vmul.f32 0.00390625, %v210_v20 }
  0xb1   :  { %v365_v11 = vmul.f32 0.00390625, %v207_v21  ;;  %v552_v21 = vrot.slane %v359_v7, %v1912_v0  ;;  %v548_v7 = vsel %vm496_vm1, %v547_v18, %v543_v14 }
  0xb2   :  { %v586_v58 = vrot.slane %v366_v10, %v1909_v63 }
  0xb3   :  { %v192_v22 = vpop.xlane.xlu1 %191  ;;  %v582_v60 = vrot.slane %v365_v11, %v1906_v61 }
  0xb4   :  { %v168_v23 = vpop.xlane.xlu0 %167  ;;  %v360_v12 = vmul.f32 0.00390625, %v192_v22  ;;  %v502_v22 = vrot.slane %v351_v8, %v1912_v0  ;;  %v497_v8 = vsel %vm496_vm1, %v495_v19, %v490_v55 }
  0xb5   :  { %v352_v13 = vmul.f32 0.00390625, %v168_v23 }
  0xb6   :  { %v557_v62 = vrot.slane %v360_v12, %v1917_v5  ;;  %v553_v12 = vsel %vm503_vm2, %v552_v21, %v548_v7 }
  0xb7   :  { %v1843_v24 = vpop.xlane.xlu1 %230  ;;  %v509_v2 = vrot.slane %v352_v13, %v1917_v5  ;;  %v504_v13 = vsel %vm503_vm2, %v502_v22, %v497_v8 }
  0xb8   :  { %v1845_v25 = vpop.xlane.xlu0 %212  ;;  %v558_v14 = vsel %vm510_vm3, %v557_v62, %v553_v12 }
  0xb9   :  { %v367_v56 = vmul.f32 0.00390625, %v1845_v25  ;;  %v373_v25 = vmul.f32 0.00390625, %v1843_v24  ;;  %v511_v55 = vsel %vm510_vm3, %v509_v2, %v504_v13 }
  0xbb   :  { %v1847_v26 = vpop.xlane.xlu1 %170  ;;  %v591_v10 = vrot.slane %v367_v56, %v1912_v0 }
  0xbc   :  { %v1849_v27 = vpop.xlane.xlu0 %233  ;;  %v353_v23 = vmul.f32 0.00390625, %v1847_v26  ;;  %v1949_v26 = vsub.s32 %v533_v17, %v1899_v54  ;;  %v587_v17 = vsel %vm496_vm1, %v586_v58, %v582_v60 }
  0xbd   :  { %v374_v53 = vmul.f32 0.00390625, %v1849_v27 }
  0xbe   :  { %v516_v15 = vrot.slane %v353_v23, %v1922_v9  ;;  %v592_v23 = vsel %vm503_vm2, %v591_v10, %v587_v17 }
  0xbf   :  { %v1851_v28 = vpop.xlane.xlu1 %215  ;;  %v625_v16 = vrot.slane %v374_v53, %v1909_v63 }
  0xc0   :  { %v1853_v29 = vpop.xlane.xlu0 %194  ;;  %v368_v11 = vmul.f32 0.00390625, %v1851_v28  ;;  %v621_v28 = vrot.slane %v373_v25, %v1906_v61  ;;  %v518_v62 = vsel %vm517_vm4, %v516_v15, %v511_v55 }
  0xc1   :  { %v361_v18 = vmul.f32 0.00390625, %v1853_v29 }
  0xc2   :  { %v596_v53 = vrot.slane %v368_v11, %v1917_v5 }
  0xc3   :  { %v1855_v30 = vpop.xlane.xlu1 %254  ;;  %v562_v2 = vrot.slane %v361_v18, %v1922_v9 }
  0xc4   :  { %v1857_v31 = vpop.xlane.xlu0 %236  ;;  %v381_v58 = vmul.f32 0.00390625, %v1855_v30 }
  0xc5   :  { %v375_v19 = vmul.f32 0.00390625, %v1857_v31  ;;  %v626_v31 = vsel %vm496_vm1, %v625_v16, %v621_v28  ;;  %v563_v17 = vsel %vm517_vm4, %v562_v2, %v558_v14 }
  0xc7   :  { %v1859_v32 = vpop.xlane.xlu1 %173 }
  0xc8   :  { %v1861_v33 = vpop.xlane.xlu0 %257  ;;  %v354_v56 = vmul.f32 0.00390625, %v1859_v32 }
  0xc9   :  { %v382_v21 = vmul.f32 0.00390625, %v1861_v33 }
  0xca   :  { %v523_v8 = vrot.slane %v354_v56, %v1943_v3 }
  0xcb   :  { %v1863_v34 = vpop.xlane.xlu1 %218  ;;  %v664_v10 = vrot.slane %v382_v21, %v1909_v63 }
  0xcc   :  { %v1865_v35 = vpop.xlane.xlu0 %197  ;;  %v369_v60 = vmul.f32 0.00390625, %v1863_v34  ;;  %v630_v34 = vrot.slane %v375_v19, %v1912_v0  ;;  %v525_v19 = vsel %vm524_vm5, %v523_v8, %v518_v62 }
  0xcd   :  { %v362_v32 = vmul.f32 0.00390625, %v1865_v35  ;;  %v597_v35 = vsel %vm510_vm3, %v596_v53, %v592_v23 }
  0xcf   :  { %v1867_v36 = vpop.xlane.xlu1 %260 }
  0xd0   :  { %v1869_v37 = vpop.xlane.xlu0 %239  ;;  %v383_v33 = vmul.f32 0.00390625, %v1867_v36  ;;  %v660_v36 = vrot.slane %v381_v58, %v1906_v61 }
  0xd1   :  { %v376_v25 = vmul.f32 0.00390625, %v1869_v37  ;;  %v601_v37 = vrot.slane %v369_v60, %v1922_v9 }
  0xd2   :  { %v669_v15 = vrot.slane %v383_v33, %v1912_v0  ;;  %v665_v56 = vsel %vm496_vm1, %v664_v10, %v660_v36 }
  0xd3   :  { %v1871_v38 = vpop.xlane.xlu1 %281  ;;  %v635_v55 = vrot.slane %v376_v25, %v1917_v5 }
  0xd4   :  { %v1873_v39 = vpop.xlane.xlu0 %278  ;;  %v390_v7 = vmul.f32 0.00390625, %v1871_v38  ;;  %v670_v62 = vsel %vm503_vm2, %v669_v15, %v665_v56 }
  0xd5   :  { %v389_v30 = vmul.f32 0.00390625, %v1873_v39  ;;  %v567_v39 = vrot.slane %v362_v32, %v1943_v3 }
  0xd6   :  { %v703_v18 = vrot.slane %v390_v7, %v1909_v63 }
  0xd7   :  { %v1875_v40 = vpop.xlane.xlu1 %200  ;;  %v699_v28 = vrot.slane %v389_v30, %v1906_v61  ;;  %v568_v60 = vsel %vm524_vm5, %v567_v39, %v563_v17 }
  0xd8   :  { %v1877_v41 = vpop.xlane.xlu0 %176  ;;  %v363_v11 = vmul.f32 0.00390625, %v1875_v40 }
  0xd9   :  { %v355_v38 = vmul.f32 0.00390625, %v1877_v41  ;;  %v631_v41 = vsel %vm503_vm2, %v630_v34, %v626_v31  ;;  %v704_v2 = vsel %vm496_vm1, %v703_v18, %v699_v28 }
  0xda   :  { %v572_v21 = vrot.slane %v363_v11, %v1946_v4  ;;  %v636_v33 = vsel %vm510_vm3, %v635_v55, %v631_v41 }
  0xdb   :  { %v1879_v42 = vpop.xlane.xlu1 %242  ;;  %v530_v14 = vrot.slane %v355_v38, %v1946_v4 }
  0xdc   :  { %v1881_v43 = vpop.xlane.xlu0 %221  ;;  %v377_v16 = vmul.f32 0.00390625, %v1879_v42 }
  0xdd   :  { %v370_v40 = vmul.f32 0.00390625, %v1881_v43  ;;  %v602_v43 = vsel %vm517_vm4, %v601_v37, %v597_v35  ;;  %v532_v10 = vsel %vm531_vm6, %v530_v14, %v525_v19 }
  0xde   :  { %v640_v31 = vrot.slane %v377_v16, %v1922_v9 }
  0xdf   :  { %v1883_v44 = vpop.xlane.xlu1 %284  ;;  %v606_v32 = vrot.slane %v370_v40, %v1943_v3 }
  0xe0   :  { %v1885_v45 = vpop.xlane.xlu0 %263  ;;  %v391_v25 = vmul.f32 0.00390625, %v1883_v44  ;;  %v641_v36 = vsel %vm517_vm4, %v640_v31, %v636_v33 }
  0xe1   :  { %v384_v7 = vmul.f32 0.00390625, %v1885_v45  ;;  %v607_v45 = vsel %vm524_vm5, %v606_v32, %v602_v43 }
  0xe3   :  { %v1887_v46 = vpop.xlane.xlu1 %305  ;;  %v674_v15 = vrot.slane %v384_v7, %v1917_v5 }
  0xe4   :  { %v1889_v47 = vpop.xlane.xlu0 %302  ;;  %v398_v30 = vmul.f32 0.00390625, %v1887_v46 }
  0xe5   :  { %v397_v11 = vmul.f32 0.00390625, %v1889_v47 }
  0xe6   :  { %v742_v16 = vrot.slane %v398_v30, %v1909_v63 }
  0xe7   :  { %v1891_v48 = vpop.xlane.xlu1 %203 }
  0xe8   :  { %v1893_v49 = vpop.xlane.xlu0 %179  ;;  %v364_v23 = vmul.f32 0.00390625, %v1891_v48 }
  0xe9   :  { %v356_v53 = vmul.f32 0.00390625, %v1893_v49  ;;  %v573_v49 = vsel %vm531_vm6, %v572_v21, %v568_v60 }
  0xea   :  { %v577_v35 = vrot.slane %v364_v23, %v1949_v26  ;;  %v675_v23 = vsel %vm510_vm3, %v674_v15, %v670_v62 }
  0xeb   :  { %v1895_v51 = vpop.xlane.xlu1 %245  ;;  %v537_v44 = vrot.slane %v356_v53, %v1949_v26 }
  0xec   :  { %v1897_v52 = vpop.xlane.xlu0 %224  ;;  %v378_v46 = vmul.f32 0.00390625, %v1895_v51  ;;  %v738_v51 = vrot.slane %v397_v11, %v1906_v61 }
  0xed   :  { %v371_v48 = vmul.f32 0.00390625, %v1897_v52  ;;  %v539_v18 = vsel %vm538_vm7, %v537_v44, %v532_v10 }
  0xef   :  { %v1901_v57 = vpop.xlane.xlu1 %287  ;;  %v611_v38 = vrot.slane %v371_v48, %v1946_v4 }
  0xf0   :  { %v1903_v59 = vpop.xlane.xlu0 %266  ;;  %v392_v37 = vmul.f32 0.00390625, %v1901_v57  ;;  %v578_v57 = vsel %vm538_vm7, %v577_v35, %v573_v49 }
  0xf1   :  { %v385_v39 = vmul.f32 0.00390625, %v1903_v59  ;;  %v612_v21 = vsel %vm531_vm6, %v611_v38, %v607_v45 }
  0xf2   :  { %v713_v41 = vrot.slane %v392_v37, %v1917_v5 }
  0xf3   :  { %v1914_v1 = vpop.xlane.xlu1 %326  ;;  %v679_v43 = vrot.slane %v385_v39, %v1922_v9 }
  0xf4   :  { %v1919_v6 = vpop.xlane.xlu0 %308  ;;  %v405_v19 = vmul.f32 0.00390625, %v1914_v1  ;;  %v743_v1 = vsel %vm496_vm1, %v742_v16, %v738_v51 }
  0xf5   :  { %v399_v47 = vmul.f32 0.00390625, %v1919_v6  ;;  %v645_v6 = vrot.slane %v378_v46, %v1943_v3 }
  0xf6   :  { %v777_v48 = vrot.slane %v405_v19, %v1906_v61 }
  0xf7   :  { %v1925_v50 = vpop.xlane.xlu1 %227  ;;  %v747_v14 = vrot.slane %v399_v47, %v1912_v0 }
  0xf8   :  { %v1931_v20 = vpop.xlane.xlu0 %329  ;;  %v372_v34 = vmul.f32 0.00390625, %v1925_v50  ;;  %v708_v50 = vrot.slane %v391_v25, %v1912_v0  ;;  %v646_v25 = vsel %vm524_vm5, %v645_v6, %v641_v36 }
  0xf9   :  { %v406_v17 = vmul.f32 0.00390625, %v1931_v20  ;;  %v748_v49 = vsel %vm503_vm2, %v747_v14, %v743_v1 }
  0xfa   :  { %v616_v40 = vrot.slane %v372_v34, %v1949_v26  ;;  %v709_v20 = vsel %vm503_vm2, %v708_v50, %v704_v2 }
  0xfb   :  { %v1951_v27 = vpop.xlane.xlu1 %269  ;;  %v781_v53 = vrot.slane %v406_v17, %v1909_v63  ;;  %v714_v62 = vsel %vm510_vm3, %v713_v41, %v709_v20 }
  0xfc   :  { %v1957_v24 = vpop.xlane.xlu0 %248  ;;  %v386_v28 = vmul.f32 0.00390625, %v1951_v27  ;;  %v617_v27 = vsel %vm538_vm7, %v616_v40, %v612_v21 }
  0xfd   :  { %v379_v56 = vmul.f32 0.00390625, %v1957_v24  ;;  %v814_v24 = vsel %vm813_vm8, %v578_v57, %v539_v18  ;;  %v782_v34 = vsel %vm496_vm1, %v781_v53, %v777_v48  ;;  %vm902_vm1 = vcmask 31744  }
  0xfe   :  { %v684_v32 = vrot.slane %v386_v28, %v1943_v3  ;;  %v816_v7 = vsel %vm815_vm9, %v617_v27, %v814_v24 }
  0xff   :  { %v1971_v22 = vpop.xlane.xlu1 %311  ;;  %v650_v63 = vrot.slane %v379_v56, %v1946_v4 }
 0x100   :  { %v1977_v29 = vpop.xlane.xlu0 %290  ;;  %v400_v60 = vmul.f32 0.00390625, %v1971_v22  ;;  %v680_v22 = vsel %vm517_vm4, %v679_v43, %v675_v23 }
 0x101   :  { %v393_v33 = vmul.f32 0.00390625, %v1977_v29  ;;  %v685_v61 = vsel %vm524_vm5, %v684_v32, %v680_v22 }
 0x102   :  { %v752_v29 = vrot.slane %v400_v60, %v1917_v5 }
 0x103   :  { %v1991_v12 = vpop.xlane.xlu1 %251  ;;  %v718_v44 = vrot.slane %v393_v33, %v1922_v9 }
 0x104   :  { %v1997_v13 = vpop.xlane.xlu0 %332  ;;  %v380_v30 = vmul.f32 0.00390625, %v1991_v12  ;;  %v651_v12 = vsel %vm531_vm6, %v650_v63, %v646_v25  ;;  %v753_v15 = vsel %vm510_vm3, %v752_v29, %v748_v49 }
 0x105   :  { %v407_v10 = vmul.f32 0.00390625, %v1997_v13  ;;  %v719_v17 = vsel %vm517_vm4, %v718_v44, %v714_v62 }
 0x106   :  { %v655_v13 = vrot.slane %v380_v30, %v1949_v26 }
 0x107   :  { %v2011_v42 = vpop.xlane.xlu1 %293  ;;  %v786_v16 = vrot.slane %v407_v10, %v1912_v0 }
 0x108   :  { %v2017_v58 = vpop.xlane.xlu0 %272  ;;  %v394_v11 = vmul.f32 0.00390625, %v2011_v42  ;;  %v656_v6 = vsel %vm538_vm7, %v655_v13, %v651_v12  ;;  %v1023_v13 = vsub.s32 1, %v1899_v54 }
 0x109   :  { %v387_v36 = vmul.f32 0.00390625, %v2017_v58  ;;  %v787_v20 = vsel %vm503_vm2, %v786_v16, %v782_v34  ;;  %v818_v48 = vsel %vm817_vm10, %v656_v6, %v816_v7  ;;  %v1602_v6 = vld [vmem:[#allocation2 + $0x18] sm:$0xff] }
 0x10a   :  { %v723_v58 = vrot.slane %v394_v11, %v1943_v3 }
 0x10b   :  { %v2031_v8 = vpop.xlane.xlu1 %335 }
 0x10c   :  { %v315_v52 = vpop.xlane.xlu0 %314  ;;  %v408_v42 = vmul.f32 0.00390625, %v2031_v8  ;;  %v724_v21 = vsel %vm524_vm5, %v723_v58, %v719_v17  ;;  %v1128_v58 = vsub.s32 4, %v1899_v54 }
 0x10d   :  { %v401_v45 = vmul.f32 0.00390625, %v315_v52 }
 0x10e   :  { %v791_v41 = vrot.slane %v408_v42, %v1917_v5 }
 0x10f   :  { %v297_v55 = vpop.xlane.xlu1 %296  ;;  %v757_v51 = vrot.slane %v401_v45, %v1922_v9 }
 0x110   :  { %v276_v59 = vpop.xlane.xlu0 %275  ;;  %v395_v37 = vmul.f32 0.00390625, %v297_v55  ;;  %v689_v55 = vrot.slane %v387_v36, %v1946_v4 }
 0x111   :  { %v388_v50 = vmul.f32 0.00390625, %v276_v59  ;;  %v758_v53 = vsel %vm517_vm4, %v757_v51, %v753_v15  ;;  %v1093_v15 = vsub.s32 3, %v1899_v54 }
 0x112   :  { %v728_v18 = vrot.slane %v395_v37, %v1946_v4  ;;  %v690_v27 = vsel %vm531_vm6, %v689_v55, %v685_v61  ;;  %v988_v37 = vsub.s32 0, %v1899_v54  ;;  %v1198_v55 = vsub.s32 6, %v1899_v54 }
 0x113   :  { %v339_v31 = vpop.xlane.xlu1 %338  ;;  %v694_v28 = vrot.slane %v388_v50, %v1949_v26 }
 0x114   :  { %v318_v2 = vpop.xlane.xlu0 %317  ;;  %v409_v52 = vmul.f32 0.00390625, %v339_v31  ;;  %v729_v1 = vsel %vm531_vm6, %v728_v18, %v724_v21 }
 0x115   :  { %v402_v38 = vmul.f32 0.00390625, %v318_v2  ;;  %v695_v24 = vsel %vm538_vm7, %v694_v28, %v690_v27  ;;  %v1606_v27 = vld [vmem:[#allocation2 + $0x28] sm:$0xff] }
 0x116   :  { %v796_v43 = vrot.slane %v409_v52, %v1922_v9  ;;  %v792_v9 = vsel %vm510_vm3, %v791_v41, %v787_v20  ;;  %v820_v49 = vsel %vm819_vm11, %v695_v24, %v818_v48  ;;  %v1604_v20 = vld [vmem:[#allocation2 + $0x8] sm:$0xff] }
 0x117   :  { %v321_v35 = vpop.xlane.xlu1 %320  ;;  %v762_v59 = vrot.slane %v402_v38, %v1943_v3 }
 0x118   :  { %v300_v46 = vpop.xlane.xlu0 %299  ;;  %v403_v39 = vmul.f32 0.00390625, %v321_v35 }
 0x119   :  { %v396_v47 = vmul.f32 0.00390625, %v300_v46  ;;  %v763_v32 = vsel %vm524_vm5, %v762_v59, %v758_v53  ;;  %v1601_v59 = vld [vmem:[#allocation2 + $0x10] sm:$0xff] }
 0x11a   :  { %v767_v19 = vrot.slane %v403_v39, %v1946_v4  ;;  %v1058_v39 = vsub.s32 2, %v1899_v54 }
 0x11b   :  { %v324_v40 = vpop.xlane.xlu1 %323  ;;  %v733_v56 = vrot.slane %v396_v47, %v1949_v26 }
 0x11c   :  { %v404_v57 = vmul.f32 0.00390625, %v324_v40  ;;  %v342_v8 = vpop.xlane.xlu0 %341  ;;  %v768_v2 = vsel %vm531_vm6, %v767_v19, %v763_v32  ;;  %v1163_v40 = vsub.s32 5, %v1899_v54  ;;  %v1603_v19 = vld [vmem:[#allocation2] sm:$0xff] }
 0x11d   :  { %v410_v0 = vmul.f32 0.00390625, %v342_v8  ;;  %v734_v25 = vsel %vm538_vm7, %v733_v56, %v729_v1 }
 0x11e   :  { %v772_v14 = vrot.slane %v404_v57, %v1949_v26  ;;  %v822_v29 = vsel %vm821_vm12, %v734_v25, %v820_v49  ;;  %v1233_v57 = vsub.s32 7, %v1899_v54 }
 0x11f   :  { %v348_v23 = vpop.xlane.xlu1 %347  ;;  %v801_v60 = vrot.slane %v410_v0, %v1943_v3  ;;  %v797_v3 = vsel %vm517_vm4, %v796_v43, %v792_v9 }
 0x120   :  { %v345_v5 = vpop.xlane.xlu0 %344  ;;  %v412_v31 = vmul.f32 0.00390625, %v348_v23  ;;  %v773_v63 = vsel %vm538_vm7, %v772_v14, %v768_v2  ;;  %v1605_v14 = vld [vmem:[#allocation2 + $0x20] sm:$0xff]  ;;  %v1610_v2 = vld [vmem:[#allocation2 + $0x38] sm:$0xff] }
 0x121   :  { %v411_v33 = vmul.f32 0.00390625, %v345_v5  ;;  %v802_v30 = vsel %vm524_vm5, %v801_v60, %v797_v3  ;;  %v824_v7 = vsel %vm823_vm13, %v773_v63, %v822_v29  ;;  %v1607_v60 = vld [vmem:[#allocation2 + $0x40] sm:$0xff]  ;;  %v1612_v3 = vld [vmem:[#allocation2 + $0x68] sm:$0xff]  ;;  %v1614_v29 = vld [vmem:[#allocation2 + $0x58] sm:$0xff] }
 0x122   :  { %v811_v62 = vrot.slane %v412_v31, %v1949_v26  ;;  %v1608_v31 = vld [vmem:[#allocation2 + $0x48] sm:$0xff] }
 0x123   :  { %v806_v22 = vrot.slane %v411_v33, %v1946_v4  ;;  %v901_v4 = vld [vmem:[%s2162_s2] sm:$0xf]  ;;  %v1609_v33 = vld [vmem:[#allocation2 + $0x30] sm:$0xff]  ;;  %s1783_s2 = smov [#allocation5]  }
 0x124   :  { %1574 = vmatpush3.msk.msra.mxu1 %vm906_vm0, %v901_v4  ;;  %v1616_v4 = vld [vmem:[#allocation2 + $0x88] sm:$0xff]  ;;  %s1527_s15 = sshll.u32 %s1783_s2, 4  ;;  %s1528_s15 = int_to_ptr.vmem [resolvable:$true] %s1527_s15 }
 0x125   :  { %v807_v34 = vsel %vm531_vm6, %v806_v22, %v802_v30  ;;  %v1613_v30 = vld [vmem:[#allocation2 + $0x50] sm:$0xff]  ;;  %s1751_s16 = scalar_lea.vmem %s1528_s15, 16384  ;;  %p1756_p9 = scmp.lt.s32.totalorder %s1528_s15, %s1528_s15 }
 0x126   :  { %v812_v26 = vsel %vm538_vm7, %v811_v62, %v807_v34  ;;  %v1611_v62 = vld [vmem:[#allocation2 + $0x60] sm:$0xff]  ;;  %p1752_p8 = scmp.ne.s32.totalorder %s1528_s15, %s1751_s16  ;;  %p1757_p10 = scmp.lt.s32.totalorder %s1751_s16, %s1751_s16 }
 0x127   :  { %v826_v10 = vsel %vm825_vm14, %v812_v26, %v824_v7  ;;  %v1615_v7 = vld [vmem:[#allocation2 + $0x80] sm:$0xff] }
 0x128   :  { %1571 = vmatmul.mubr.msk.f32.vlgmr.msra.gmra.mrb[0].mxu0 %vm827_vm15, %v826_v10  ;;  %p1758_p11 = por %p1757_p10, %p1756_p9 }
 0x12a   :  { %p1759_p12 = pnand %p1758_p11, %p1752_p8 }
 0x1fb   :  { %v896_v11 = vpop.f32.mrb[0].mxu0 }
 0x1fc   :  { %v900_v35 = vmax.f32 %v896_v11, 0.0  ;;  %v1572_v61 = vpop.f32.mrb[1].mxu0 }
 0x1fe   :  { %1576 = vmatmul.mubr.msk.f32.vlgmr.msra.gmra.mrb[0].mxu1 %vm902_vm1, %v900_v35 }
 0x2d1   :  { %v976_v44 = vpop.f32.mrb[0].mxu1 }
 0x2d2   :  { %v1542_v36 = vmul.f32 -1.442695, %v976_v44  ;;  %v1577_v45 = vpop.f32.mrb[1].mxu1  ;;  %v1617_v44 = vld [vmem:[#allocation2 + $0x70] sm:$0xff] }
 0x2d3   :  { %v1618_v45 = vld [vmem:[#allocation2 + $0x78] sm:$0xff] }
 0x2d4   :  { %1597 = vpow2.f32 %v1542_v36 }
 0x2de   :  { %v1598_v46 = vpop.eup %1597 }
 0x2df   :  { %v983_v12 = vadd.f32 1.0, %v1598_v46 }
 0x2e1   :  { %1599 = vrcp.f32 %v983_v12  ;;  %v1619_v12 = vld [vmem:[#allocation2 + $0xa0] sm:$0xff] }
 0x2eb   :  { %v2128_v50 = vpop.eup %1599 }
 0x2ec   :  { %v989_v38 = vrot.slane %v2128_v50, %v988_v37  ;;  %v1024_v42 = vrot.slane %v2128_v50, %v1023_v13  ;;  %v1059_v47 = vrot.slane %v2128_v50, %v1058_v39  ;;  %v1094_v16 = vrot.slane %v2128_v50, %v1093_v15  ;;  %v1621_v39 = vld [vmem:[#allocation2 + $0x90] sm:$0xff]  ;;  %v1622_v15 = vld [vmem:[#allocation2 + $0x98] sm:$0xff] }
 0x2ed   :  { %v1129_v52 = vrot.slane %v2128_v50, %v1128_v58  ;;  %v1164_v17 = vrot.slane %v2128_v50, %v1163_v40  ;;  %v1199_v51 = vrot.slane %v2128_v50, %v1198_v55  ;;  %v1234_v8 = vrot.slane %v2128_v50, %v1233_v57  ;;  %v1620_v50 = vld [vmem:[#allocation2 + $0xa8] sm:$0xff]  ;;  %v1623_v58 = vld [vmem:[#allocation2 + $0xc0] sm:$0xff]  ;;  %v1625_v57 = vld [vmem:[#allocation2 + $0xb0] sm:$0xff] }
 0x2ee   :  { %995 = vbcast.lane.b32.xlu1 %v989_v38, 264  ;;  %991 = vbcast.lane.b32.xlu0 %v989_v38, 256  ;;  %v1624_v40 = vld [vmem:[#allocation2 + $0xc8] sm:$0xff] }
 0x2f2   :  { %999 = vbcast.lane.b32.xlu1 %v989_v38, 272  ;;  %1007 = vbcast.lane.b32.xlu0 %v989_v38, 288 }
 0x2f6   :  { %1003 = vbcast.lane.b32.xlu1 %v989_v38, 280  ;;  %1015 = vbcast.lane.b32.xlu0 %v989_v38, 304 }
 0x2fa   :  { %1011 = vbcast.lane.b32.xlu1 %v989_v38, 296  ;;  %1026 = vbcast.lane.b32.xlu0 %v1024_v42, 256 }
 0x2fe   :  { %1019 = vbcast.lane.b32.xlu1 %v989_v38, 312  ;;  %1034 = vbcast.lane.b32.xlu0 %v1024_v42, 272 }
 0x302   :  { %1030 = vbcast.lane.b32.xlu1 %v1024_v42, 264  ;;  %1042 = vbcast.lane.b32.xlu0 %v1024_v42, 288 }
 0x306   :  { %1038 = vbcast.lane.b32.xlu1 %v1024_v42, 280  ;;  %1050 = vbcast.lane.b32.xlu0 %v1024_v42, 304 }
 0x30a   :  { %1046 = vbcast.lane.b32.xlu1 %v1024_v42, 296  ;;  %1061 = vbcast.lane.b32.xlu0 %v1059_v47, 256 }
 0x30e   :  { %1054 = vbcast.lane.b32.xlu1 %v1024_v42, 312  ;;  %1069 = vbcast.lane.b32.xlu0 %v1059_v47, 272 }
 0x312   :  { %1065 = vbcast.lane.b32.xlu1 %v1059_v47, 264  ;;  %1077 = vbcast.lane.b32.xlu0 %v1059_v47, 288 }
 0x316   :  { %1073 = vbcast.lane.b32.xlu1 %v1059_v47, 280  ;;  %1085 = vbcast.lane.b32.xlu0 %v1059_v47, 304 }
 0x31a   :  { %1081 = vbcast.lane.b32.xlu1 %v1059_v47, 296  ;;  %1096 = vbcast.lane.b32.xlu0 %v1094_v16, 256 }
 0x31e   :  { %1089 = vbcast.lane.b32.xlu1 %v1059_v47, 312  ;;  %1104 = vbcast.lane.b32.xlu0 %v1094_v16, 272 }
 0x322   :  { %1100 = vbcast.lane.b32.xlu1 %v1094_v16, 264  ;;  %1112 = vbcast.lane.b32.xlu0 %v1094_v16, 288 }
 0x326   :  { %1108 = vbcast.lane.b32.xlu1 %v1094_v16, 280  ;;  %1120 = vbcast.lane.b32.xlu0 %v1094_v16, 304 }
 0x32a   :  { %1116 = vbcast.lane.b32.xlu1 %v1094_v16, 296  ;;  %1131 = vbcast.lane.b32.xlu0 %v1129_v52, 256 }
 0x32e   :  { %1124 = vbcast.lane.b32.xlu1 %v1094_v16, 312  ;;  %1139 = vbcast.lane.b32.xlu0 %v1129_v52, 272 }
 0x332   :  { %1135 = vbcast.lane.b32.xlu1 %v1129_v52, 264  ;;  %1147 = vbcast.lane.b32.xlu0 %v1129_v52, 288 }
 0x336   :  { %1143 = vbcast.lane.b32.xlu1 %v1129_v52, 280  ;;  %1155 = vbcast.lane.b32.xlu0 %v1129_v52, 304 }
 0x33a   :  { %1151 = vbcast.lane.b32.xlu1 %v1129_v52, 296  ;;  %1166 = vbcast.lane.b32.xlu0 %v1164_v17, 256 }
 0x33e   :  { %1159 = vbcast.lane.b32.xlu1 %v1129_v52, 312  ;;  %1174 = vbcast.lane.b32.xlu0 %v1164_v17, 272 }
 0x342   :  { %1170 = vbcast.lane.b32.xlu1 %v1164_v17, 264  ;;  %1182 = vbcast.lane.b32.xlu0 %v1164_v17, 288 }
 0x346   :  { %1178 = vbcast.lane.b32.xlu1 %v1164_v17, 280  ;;  %1190 = vbcast.lane.b32.xlu0 %v1164_v17, 304 }
 0x34a   :  { %1186 = vbcast.lane.b32.xlu1 %v1164_v17, 296  ;;  %1201 = vbcast.lane.b32.xlu0 %v1199_v51, 256 }
 0x34e   :  { %1194 = vbcast.lane.b32.xlu1 %v1164_v17, 312  ;;  %1209 = vbcast.lane.b32.xlu0 %v1199_v51, 272 }
 0x352   :  { %1205 = vbcast.lane.b32.xlu1 %v1199_v51, 264  ;;  %1217 = vbcast.lane.b32.xlu0 %v1199_v51, 288 }
 0x356   :  { %1213 = vbcast.lane.b32.xlu1 %v1199_v51, 280  ;;  %1225 = vbcast.lane.b32.xlu0 %v1199_v51, 304 }
 0x35a   :  { %1221 = vbcast.lane.b32.xlu1 %v1199_v51, 296  ;;  %1236 = vbcast.lane.b32.xlu0 %v1234_v8, 256 }
 0x35e   :  { %1229 = vbcast.lane.b32.xlu1 %v1199_v51, 312  ;;  %1244 = vbcast.lane.b32.xlu0 %v1234_v8, 272 }
 0x360   :  { %v996_v18 = vpop.permute.xlu1 %995  ;;  %v992_v28 = vpop.permute.xlu0 %991 }
 0x361   :  { %v1268_v0 = vmul.f32 %v1601_v59, %v996_v18  ;;  %v1269_v41 = vmul.f32 %v1602_v6, %v996_v18  ;;  %v1266_v56 = vmul.f32 %v1603_v19, %v992_v28  ;;  %v1267_v21 = vmul.f32 %v1604_v20, %v992_v28  ;;  %v1626_v18 = vld [vmem:[#allocation2 + $0xb8] sm:$0xff]  ;;  %v1627_v59 = vld [vmem:[#allocation2 + $0xe0] sm:$0xff]  ;;  %v1628_v6 = vld [vmem:[#allocation2 + $0xe8] sm:$0xff] }
 0x362   :  { %1240 = vbcast.lane.b32.xlu1 %v1234_v8, 264  ;;  %1252 = vbcast.lane.b32.xlu0 %v1234_v8, 288  ;;  %v1629_v20 = vld [vmem:[#allocation2 + $0xd0] sm:$0xff] }
 0x363   :  { %1396 = vst [vmem:[#allocation5 + $0x10] sm:$0xff] %v1268_v0  ;;  %1397 = vst [vmem:[#allocation5 + $0x18] sm:$0xff] %v1269_v41 }
 0x364   :  { %1394 = vst [vmem:[#allocation5] sm:$0xff] %v1266_v56  ;;  %1395 = vst [vmem:[#allocation5 + $0x8] sm:$0xff] %v1267_v21  ;;  %v1000_v54 = vpop.permute.xlu1 %999  ;;  %v1008_v43 = vpop.permute.xlu0 %1007 }
 0x365   :  { %v1270_v23 = vmul.f32 %v1605_v14, %v1000_v54  ;;  %v1271_v53 = vmul.f32 %v1606_v27, %v1000_v54  ;;  %v1274_v5 = vmul.f32 %v1607_v60, %v1008_v43  ;;  %v1275_v1 = vmul.f32 %v1608_v31, %v1008_v43  ;;  %v1630_v54 = vld [vmem:[#allocation2 + $0xd8] sm:$0xff]  ;;  %v1631_v14 = vld [vmem:[#allocation2 + $0x100] sm:$0xff]  ;;  %v1632_v27 = vld [vmem:[#allocation2 + $0x108] sm:$0xff] }
 0x366   :  { %1248 = vbcast.lane.b32.xlu1 %v1234_v8, 280  ;;  %1260 = vbcast.lane.b32.xlu0 %v1234_v8, 304  ;;  %v1633_v31 = vld [vmem:[#allocation2 + $0xf0] sm:$0xff] }
 0x367   :  { %1398 = vst [vmem:[#allocation5 + $0x20] sm:$0xff] %v1270_v23  ;;  %1399 = vst [vmem:[#allocation5 + $0x28] sm:$0xff] %v1271_v53 }
 0x368   :  { %1402 = vst [vmem:[#allocation5 + $0x40] sm:$0xff] %v1274_v5  ;;  %1403 = vst [vmem:[#allocation5 + $0x48] sm:$0xff] %v1275_v1  ;;  %v1004_v24 = vpop.permute.xlu1 %1003  ;;  %v1016_v32 = vpop.permute.xlu0 %1015 }
 0x369   :  { %v1272_v9 = vmul.f32 %v1609_v33, %v1004_v24  ;;  %v1273_v25 = vmul.f32 %v1610_v2, %v1004_v24  ;;  %v1278_v48 = vmul.f32 %v1611_v62, %v1016_v32  ;;  %v1279_v63 = vmul.f32 %v1612_v3, %v1016_v32  ;;  %v1634_v24 = vld [vmem:[#allocation2 + $0xf8] sm:$0xff]  ;;  %v1635_v33 = vld [vmem:[#allocation2 + $0x120] sm:$0xff]  ;;  %v1636_v2 = vld [vmem:[#allocation2 + $0x128] sm:$0xff] }
 0x36a   :  { %1256 = vbcast.lane.b32.xlu1 %v1234_v8, 296  ;;  %v1637_v3 = vld [vmem:[#allocation2 + $0x110] sm:$0xff] }
 0x36b   :  { %1400 = vst [vmem:[#allocation5 + $0x30] sm:$0xff] %v1272_v9  ;;  %1401 = vst [vmem:[#allocation5 + $0x38] sm:$0xff] %v1273_v25 }
 0x36c   :  { %1406 = vst [vmem:[#allocation5 + $0x60] sm:$0xff] %v1278_v48  ;;  %1407 = vst [vmem:[#allocation5 + $0x68] sm:$0xff] %v1279_v63  ;;  %v1012_v22 = vpop.permute.xlu1 %1011  ;;  %v1027_v49 = vpop.permute.xlu0 %1026 }
 0x36d   :  { %v1276_v34 = vmul.f32 %v1613_v30, %v1012_v22  ;;  %v1277_v26 = vmul.f32 %v1614_v29, %v1012_v22  ;;  %v1282_v10 = vmul.f32 %v1615_v7, %v1027_v49  ;;  %v1283_v11 = vmul.f32 %v1616_v4, %v1027_v49  ;;  %v1638_v22 = vld [vmem:[#allocation2 + $0x118] sm:$0xff]  ;;  %v1639_v30 = vld [vmem:[#allocation2 + $0x140] sm:$0xff]  ;;  %v1640_v29 = vld [vmem:[#allocation2 + $0x148] sm:$0xff] }
 0x36e   :  { %1264 = vbcast.lane.b32.xlu1 %v1234_v8, 312  ;;  %v1641_v4 = vld [vmem:[#allocation2 + $0x130] sm:$0xff] }
 0x36f   :  { %1404 = vst [vmem:[#allocation5 + $0x50] sm:$0xff] %v1276_v34  ;;  %1405 = vst [vmem:[#allocation5 + $0x58] sm:$0xff] %v1277_v26 }
 0x370   :  { %1410 = vst [vmem:[#allocation5 + $0x80] sm:$0xff] %v1282_v10  ;;  %1411 = vst [vmem:[#allocation5 + $0x88] sm:$0xff] %v1283_v11  ;;  %v1020_v35 = vpop.permute.xlu1 %1019  ;;  %v1035_v61 = vpop.permute.xlu0 %1034 }
 0x371   :  { %v1280_v36 = vmul.f32 %v1617_v44, %v1020_v35  ;;  %v1281_v46 = vmul.f32 %v1618_v45, %v1020_v35  ;;  %v1286_v37 = vmul.f32 %v1619_v12, %v1035_v61  ;;  %v1287_v38 = vmul.f32 %v1620_v50, %v1035_v61  ;;  %v1642_v35 = vld [vmem:[#allocation2 + $0x138] sm:$0xff]  ;;  %v1643_v44 = vld [vmem:[#allocation2 + $0x160] sm:$0xff]  ;;  %v1644_v45 = vld [vmem:[#allocation2 + $0x168] sm:$0xff] }
 0x372   :  { %v1645_v50 = vld [vmem:[#allocation2 + $0x150] sm:$0xff] }
 0x373   :  { %1408 = vst [vmem:[#allocation5 + $0x70] sm:$0xff] %v1280_v36  ;;  %1409 = vst [vmem:[#allocation5 + $0x78] sm:$0xff] %v1281_v46 }
 0x374   :  { %1414 = vst [vmem:[#allocation5 + $0xa0] sm:$0xff] %v1286_v37  ;;  %1415 = vst [vmem:[#allocation5 + $0xa8] sm:$0xff] %v1287_v38  ;;  %v1031_v13 = vpop.permute.xlu1 %1030  ;;  %v1043_v42 = vpop.permute.xlu0 %1042 }
 0x375   :  { %v1284_v47 = vmul.f32 %v1621_v39, %v1031_v13  ;;  %v1285_v16 = vmul.f32 %v1622_v15, %v1031_v13  ;;  %v1290_v52 = vmul.f32 %v1623_v58, %v1043_v42  ;;  %v1291_v17 = vmul.f32 %v1624_v40, %v1043_v42  ;;  %v1646_v13 = vld [vmem:[#allocation2 + $0x158] sm:$0xff]  ;;  %v1647_v39 = vld [vmem:[#allocation2 + $0x180] sm:$0xff]  ;;  %v1648_v15 = vld [vmem:[#allocation2 + $0x188] sm:$0xff] }
 0x376   :  { %v1649_v40 = vld [vmem:[#allocation2 + $0x170] sm:$0xff] }
 0x377   :  { %1412 = vst [vmem:[#allocation5 + $0x90] sm:$0xff] %v1284_v47  ;;  %1413 = vst [vmem:[#allocation5 + $0x98] sm:$0xff] %v1285_v16 }
 0x378   :  { %1418 = vst [vmem:[#allocation5 + $0xc0] sm:$0xff] %v1290_v52  ;;  %1419 = vst [vmem:[#allocation5 + $0xc8] sm:$0xff] %v1291_v17  ;;  %v1039_v55 = vpop.permute.xlu1 %1038  ;;  %v1051_v51 = vpop.permute.xlu0 %1050 }
 0x379   :  { %v1288_v8 = vmul.f32 %v1625_v57, %v1039_v55  ;;  %v1289_v28 = vmul.f32 %v1626_v18, %v1039_v55  ;;  %v1294_v0 = vmul.f32 %v1627_v59, %v1051_v51  ;;  %v1295_v41 = vmul.f32 %v1628_v6, %v1051_v51  ;;  %v1650_v55 = vld [vmem:[#allocation2 + $0x178] sm:$0xff]  ;;  %v1651_v57 = vld [vmem:[#allocation2 + $0x1a0] sm:$0xff]  ;;  %v1652_v18 = vld [vmem:[#allocation2 + $0x1a8] sm:$0xff] }
 0x37a   :  { %v1653_v6 = vld [vmem:[#allocation2 + $0x190] sm:$0xff] }
 0x37b   :  { %1416 = vst [vmem:[#allocation5 + $0xb0] sm:$0xff] %v1288_v8  ;;  %1417 = vst [vmem:[#allocation5 + $0xb8] sm:$0xff] %v1289_v28 }
 0x37c   :  { %1422 = vst [vmem:[#allocation5 + $0xe0] sm:$0xff] %v1294_v0  ;;  %1423 = vst [vmem:[#allocation5 + $0xe8] sm:$0xff] %v1295_v41  ;;  %v1047_v19 = vpop.permute.xlu1 %1046  ;;  %v1062_v56 = vpop.permute.xlu0 %1061 }
 0x37d   :  { %v1292_v21 = vmul.f32 %v1629_v20, %v1047_v19  ;;  %v1293_v43 = vmul.f32 %v1630_v54, %v1047_v19  ;;  %v1298_v23 = vmul.f32 %v1631_v14, %v1062_v56  ;;  %v1299_v53 = vmul.f32 %v1632_v27, %v1062_v56  ;;  %v1654_v19 = vld [vmem:[#allocation2 + $0x198] sm:$0xff]  ;;  %v1655_v20 = vld [vmem:[#allocation2 + $0x1c0] sm:$0xff]  ;;  %v1656_v54 = vld [vmem:[#allocation2 + $0x1c8] sm:$0xff] }
 0x37e   :  { %v1657_v27 = vld [vmem:[#allocation2 + $0x1b0] sm:$0xff] }
 0x37f   :  { %1420 = vst [vmem:[#allocation5 + $0xd0] sm:$0xff] %v1292_v21  ;;  %1421 = vst [vmem:[#allocation5 + $0xd8] sm:$0xff] %v1293_v43 }
 0x380   :  { %1426 = vst [vmem:[#allocation5 + $0x100] sm:$0xff] %v1298_v23  ;;  %1427 = vst [vmem:[#allocation5 + $0x108] sm:$0xff] %v1299_v53  ;;  %v1055_v60 = vpop.permute.xlu1 %1054  ;;  %v1070_v5 = vpop.permute.xlu0 %1069 }
 0x381   :  { %v1296_v1 = vmul.f32 %v1633_v31, %v1055_v60  ;;  %v1297_v32 = vmul.f32 %v1634_v24, %v1055_v60  ;;  %v1302_v9 = vmul.f32 %v1635_v33, %v1070_v5  ;;  %v1303_v25 = vmul.f32 %v1636_v2, %v1070_v5  ;;  %v1658_v60 = vld [vmem:[#allocation2 + $0x1b8] sm:$0xff]  ;;  %v1659_v31 = vld [vmem:[#allocation2 + $0x1e0] sm:$0xff]  ;;  %v1660_v24 = vld [vmem:[#allocation2 + $0x1e8] sm:$0xff] }
 0x382   :  { %v1661_v2 = vld [vmem:[#allocation2 + $0x1d0] sm:$0xff] }
 0x383   :  { %1424 = vst [vmem:[#allocation5 + $0xf0] sm:$0xff] %v1296_v1  ;;  %1425 = vst [vmem:[#allocation5 + $0xf8] sm:$0xff] %v1297_v32 }
 0x384   :  { %1430 = vst [vmem:[#allocation5 + $0x120] sm:$0xff] %v1302_v9  ;;  %1431 = vst [vmem:[#allocation5 + $0x128] sm:$0xff] %v1303_v25  ;;  %v1066_v62 = vpop.permute.xlu1 %1065  ;;  %v1078_v48 = vpop.permute.xlu0 %1077 }
 0x385   :  { %v1300_v63 = vmul.f32 %v1637_v3, %v1066_v62  ;;  %v1301_v49 = vmul.f32 %v1638_v22, %v1066_v62  ;;  %v1306_v34 = vmul.f32 %v1639_v30, %v1078_v48  ;;  %v1307_v26 = vmul.f32 %v1640_v29, %v1078_v48  ;;  %v1662_v62 = vld [vmem:[#allocation2 + $0x1d8] sm:$0xff]  ;;  %v1663_v3 = vld [vmem:[#allocation2 + $0x200] sm:$0xff]  ;;  %v1664_v22 = vld [vmem:[#allocation2 + $0x208] sm:$0xff] }
 0x386   :  { %v1665_v29 = vld [vmem:[#allocation2 + $0x1f0] sm:$0xff] }
 0x387   :  { %1428 = vst [vmem:[#allocation5 + $0x110] sm:$0xff] %v1300_v63  ;;  %1429 = vst [vmem:[#allocation5 + $0x118] sm:$0xff] %v1301_v49 }
 0x388   :  { %1434 = vst [vmem:[#allocation5 + $0x140] sm:$0xff] %v1306_v34  ;;  %1435 = vst [vmem:[#allocation5 + $0x148] sm:$0xff] %v1307_v26  ;;  %v1074_v7 = vpop.permute.xlu1 %1073  ;;  %v1086_v10 = vpop.permute.xlu0 %1085 }
 0x389   :  { %v1304_v11 = vmul.f32 %v1641_v4, %v1074_v7  ;;  %v1305_v61 = vmul.f32 %v1642_v35, %v1074_v7  ;;  %v1310_v36 = vmul.f32 %v1643_v44, %v1086_v10  ;;  %v1311_v46 = vmul.f32 %v1644_v45, %v1086_v10  ;;  %v1666_v7 = vld [vmem:[#allocation2 + $0x1f8] sm:$0xff]  ;;  %v1667_v4 = vld [vmem:[#allocation2 + $0x220] sm:$0xff]  ;;  %v1668_v35 = vld [vmem:[#allocation2 + $0x228] sm:$0xff] }
 0x38a   :  { %v1669_v45 = vld [vmem:[#allocation2 + $0x210] sm:$0xff] }
 0x38b   :  { %1432 = vst [vmem:[#allocation5 + $0x130] sm:$0xff] %v1304_v11  ;;  %1433 = vst [vmem:[#allocation5 + $0x138] sm:$0xff] %v1305_v61 }
 0x38c   :  { %1438 = vst [vmem:[#allocation5 + $0x160] sm:$0xff] %v1310_v36  ;;  %1439 = vst [vmem:[#allocation5 + $0x168] sm:$0xff] %v1311_v46  ;;  %v1082_v12 = vpop.permute.xlu1 %1081  ;;  %v1097_v37 = vpop.permute.xlu0 %1096 }
 0x38d   :  { %v1308_v38 = vmul.f32 %v1645_v50, %v1082_v12  ;;  %v1309_v42 = vmul.f32 %v1646_v13, %v1082_v12  ;;  %v1314_v47 = vmul.f32 %v1647_v39, %v1097_v37  ;;  %v1315_v16 = vmul.f32 %v1648_v15, %v1097_v37  ;;  %v1670_v12 = vld [vmem:[#allocation2 + $0x218] sm:$0xff]  ;;  %v1671_v50 = vld [vmem:[#allocation2 + $0x240] sm:$0xff]  ;;  %v1672_v13 = vld [vmem:[#allocation2 + $0x248] sm:$0xff] }
 0x38e   :  { %v1673_v15 = vld [vmem:[#allocation2 + $0x230] sm:$0xff] }
 0x38f   :  { %1436 = vst [vmem:[#allocation5 + $0x150] sm:$0xff] %v1308_v38  ;;  %1437 = vst [vmem:[#allocation5 + $0x158] sm:$0xff] %v1309_v42 }
 0x390   :  { %1442 = vst [vmem:[#allocation5 + $0x180] sm:$0xff] %v1314_v47  ;;  %1443 = vst [vmem:[#allocation5 + $0x188] sm:$0xff] %v1315_v16  ;;  %v1090_v58 = vpop.permute.xlu1 %1089  ;;  %v1105_v52 = vpop.permute.xlu0 %1104 }
 0x391   :  { %v1312_v17 = vmul.f32 %v1649_v40, %v1090_v58  ;;  %v1313_v51 = vmul.f32 %v1650_v55, %v1090_v58  ;;  %v1318_v8 = vmul.f32 %v1651_v57, %v1105_v52  ;;  %v1319_v28 = vmul.f32 %v1652_v18, %v1105_v52  ;;  %v1674_v58 = vld [vmem:[#allocation2 + $0x238] sm:$0xff]  ;;  %v1675_v40 = vld [vmem:[#allocation2 + $0x260] sm:$0xff]  ;;  %v1676_v55 = vld [vmem:[#allocation2 + $0x268] sm:$0xff] }
 0x392   :  { %v1677_v18 = vld [vmem:[#allocation2 + $0x250] sm:$0xff] }
 0x393   :  { %1440 = vst [vmem:[#allocation5 + $0x170] sm:$0xff] %v1312_v17  ;;  %1441 = vst [vmem:[#allocation5 + $0x178] sm:$0xff] %v1313_v51 }
 0x394   :  { %1446 = vst [vmem:[#allocation5 + $0x1a0] sm:$0xff] %v1318_v8  ;;  %1447 = vst [vmem:[#allocation5 + $0x1a8] sm:$0xff] %v1319_v28  ;;  %v1101_v59 = vpop.permute.xlu1 %1100  ;;  %v1113_v0 = vpop.permute.xlu0 %1112 }
 0x395   :  { %v1316_v41 = vmul.f32 %v1653_v6, %v1101_v59  ;;  %v1317_v56 = vmul.f32 %v1654_v19, %v1101_v59  ;;  %v1322_v21 = vmul.f32 %v1655_v20, %v1113_v0  ;;  %v1323_v43 = vmul.f32 %v1656_v54, %v1113_v0  ;;  %v1678_v59 = vld [vmem:[#allocation2 + $0x258] sm:$0xff]  ;;  %v1679_v6 = vld [vmem:[#allocation2 + $0x280] sm:$0xff]  ;;  %v1680_v19 = vld [vmem:[#allocation2 + $0x288] sm:$0xff] }
 0x396   :  { %v1681_v54 = vld [vmem:[#allocation2 + $0x270] sm:$0xff] }
 0x397   :  { %1444 = vst [vmem:[#allocation5 + $0x190] sm:$0xff] %v1316_v41  ;;  %1445 = vst [vmem:[#allocation5 + $0x198] sm:$0xff] %v1317_v56 }
 0x398   :  { %1450 = vst [vmem:[#allocation5 + $0x1c0] sm:$0xff] %v1322_v21  ;;  %1451 = vst [vmem:[#allocation5 + $0x1c8] sm:$0xff] %v1323_v43  ;;  %v1109_v14 = vpop.permute.xlu1 %1108  ;;  %v1121_v23 = vpop.permute.xlu0 %1120 }
 0x399   :  { %v1320_v53 = vmul.f32 %v1657_v27, %v1109_v14  ;;  %v1321_v5 = vmul.f32 %v1658_v60, %v1109_v14  ;;  %v1326_v1 = vmul.f32 %v1659_v31, %v1121_v23  ;;  %v1327_v32 = vmul.f32 %v1660_v24, %v1121_v23  ;;  %v1682_v14 = vld [vmem:[#allocation2 + $0x278] sm:$0xff]  ;;  %v1683_v27 = vld [vmem:[#allocation2 + $0x2a0] sm:$0xff]  ;;  %v1684_v60 = vld [vmem:[#allocation2 + $0x2a8] sm:$0xff] }
 0x39a   :  { %v1685_v24 = vld [vmem:[#allocation2 + $0x290] sm:$0xff] }
 0x39b   :  { %1448 = vst [vmem:[#allocation5 + $0x1b0] sm:$0xff] %v1320_v53  ;;  %1449 = vst [vmem:[#allocation5 + $0x1b8] sm:$0xff] %v1321_v5 }
 0x39c   :  { %1454 = vst [vmem:[#allocation5 + $0x1e0] sm:$0xff] %v1326_v1  ;;  %1455 = vst [vmem:[#allocation5 + $0x1e8] sm:$0xff] %v1327_v32  ;;  %v1117_v33 = vpop.permute.xlu1 %1116  ;;  %v1132_v9 = vpop.permute.xlu0 %1131 }
 0x39d   :  { %v1324_v25 = vmul.f32 %v1661_v2, %v1117_v33  ;;  %v1325_v48 = vmul.f32 %v1662_v62, %v1117_v33  ;;  %v1330_v63 = vmul.f32 %v1663_v3, %v1132_v9  ;;  %v1331_v49 = vmul.f32 %v1664_v22, %v1132_v9  ;;  %v1686_v33 = vld [vmem:[#allocation2 + $0x298] sm:$0xff]  ;;  %v1687_v2 = vld [vmem:[#allocation2 + $0x2c0] sm:$0xff]  ;;  %v1688_v62 = vld [vmem:[#allocation2 + $0x2c8] sm:$0xff] }
 0x39e   :  { %v1689_v22 = vld [vmem:[#allocation2 + $0x2b0] sm:$0xff] }
 0x39f   :  { %1452 = vst [vmem:[#allocation5 + $0x1d0] sm:$0xff] %v1324_v25  ;;  %1453 = vst [vmem:[#allocation5 + $0x1d8] sm:$0xff] %v1325_v48 }
 0x3a0   :  { %1458 = vst [vmem:[#allocation5 + $0x200] sm:$0xff] %v1330_v63  ;;  %1459 = vst [vmem:[#allocation5 + $0x208] sm:$0xff] %v1331_v49  ;;  %v1125_v30 = vpop.permute.xlu1 %1124  ;;  %v1140_v34 = vpop.permute.xlu0 %1139 }
 0x3a1   :  { %v1328_v26 = vmul.f32 %v1665_v29, %v1125_v30  ;;  %v1329_v10 = vmul.f32 %v1666_v7, %v1125_v30  ;;  %v1334_v11 = vmul.f32 %v1667_v4, %v1140_v34  ;;  %v1335_v61 = vmul.f32 %v1668_v35, %v1140_v34  ;;  %v1690_v30 = vld [vmem:[#allocation2 + $0x2b8] sm:$0xff]  ;;  %v1691_v29 = vld [vmem:[#allocation2 + $0x2e0] sm:$0xff]  ;;  %v1692_v7 = vld [vmem:[#allocation2 + $0x2e8] sm:$0xff] }
 0x3a2   :  { %v1693_v35 = vld [vmem:[#allocation2 + $0x2d0] sm:$0xff] }
 0x3a3   :  { %1456 = vst [vmem:[#allocation5 + $0x1f0] sm:$0xff] %v1328_v26  ;;  %1457 = vst [vmem:[#allocation5 + $0x1f8] sm:$0xff] %v1329_v10 }
 0x3a4   :  { %1462 = vst [vmem:[#allocation5 + $0x220] sm:$0xff] %v1334_v11  ;;  %1463 = vst [vmem:[#allocation5 + $0x228] sm:$0xff] %v1335_v61  ;;  %v1136_v44 = vpop.permute.xlu1 %1135  ;;  %v1148_v36 = vpop.permute.xlu0 %1147 }
 0x3a5   :  { %v1332_v46 = vmul.f32 %v1669_v45, %v1136_v44  ;;  %v1333_v37 = vmul.f32 %v1670_v12, %v1136_v44  ;;  %v1338_v38 = vmul.f32 %v1671_v50, %v1148_v36  ;;  %v1339_v42 = vmul.f32 %v1672_v13, %v1148_v36  ;;  %v1694_v44 = vld [vmem:[#allocation2 + $0x2d8] sm:$0xff]  ;;  %v1695_v45 = vld [vmem:[#allocation2 + $0x300] sm:$0xff]  ;;  %v1696_v12 = vld [vmem:[#allocation2 + $0x308] sm:$0xff] }
 0x3a6   :  { %v1697_v13 = vld [vmem:[#allocation2 + $0x2f0] sm:$0xff] }
 0x3a7   :  { %1460 = vst [vmem:[#allocation5 + $0x210] sm:$0xff] %v1332_v46  ;;  %1461 = vst [vmem:[#allocation5 + $0x218] sm:$0xff] %v1333_v37 }
 0x3a8   :  { %1466 = vst [vmem:[#allocation5 + $0x240] sm:$0xff] %v1338_v38  ;;  %1467 = vst [vmem:[#allocation5 + $0x248] sm:$0xff] %v1339_v42  ;;  %v1144_v39 = vpop.permute.xlu1 %1143  ;;  %v1156_v47 = vpop.permute.xlu0 %1155 }
 0x3a9   :  { %v1336_v16 = vmul.f32 %v1673_v15, %v1144_v39  ;;  %v1337_v52 = vmul.f32 %v1674_v58, %v1144_v39  ;;  %v1342_v17 = vmul.f32 %v1675_v40, %v1156_v47  ;;  %v1343_v51 = vmul.f32 %v1676_v55, %v1156_v47  ;;  %v1698_v39 = vld [vmem:[#allocation2 + $0x2f8] sm:$0xff]  ;;  %v1699_v15 = vld [vmem:[#allocation2 + $0x320] sm:$0xff]  ;;  %v1700_v58 = vld [vmem:[#allocation2 + $0x328] sm:$0xff] }
 0x3aa   :  { %v1701_v55 = vld [vmem:[#allocation2 + $0x310] sm:$0xff] }
 0x3ab   :  { %1464 = vst [vmem:[#allocation5 + $0x230] sm:$0xff] %v1336_v16  ;;  %1465 = vst [vmem:[#allocation5 + $0x238] sm:$0xff] %v1337_v52 }
 0x3ac   :  { %1470 = vst [vmem:[#allocation5 + $0x260] sm:$0xff] %v1342_v17  ;;  %1471 = vst [vmem:[#allocation5 + $0x268] sm:$0xff] %v1343_v51  ;;  %v1152_v57 = vpop.permute.xlu1 %1151  ;;  %v1167_v8 = vpop.permute.xlu0 %1166 }
 0x3ad   :  { %v1340_v28 = vmul.f32 %v1677_v18, %v1152_v57  ;;  %v1341_v0 = vmul.f32 %v1678_v59, %v1152_v57  ;;  %v1346_v41 = vmul.f32 %v1679_v6, %v1167_v8  ;;  %v1347_v56 = vmul.f32 %v1680_v19, %v1167_v8  ;;  %v1702_v57 = vld [vmem:[#allocation2 + $0x318] sm:$0xff]  ;;  %v1703_v18 = vld [vmem:[#allocation2 + $0x340] sm:$0xff]  ;;  %v1704_v59 = vld [vmem:[#allocation2 + $0x348] sm:$0xff] }
 0x3ae   :  { %v1705_v19 = vld [vmem:[#allocation2 + $0x330] sm:$0xff] }
 0x3af   :  { %1468 = vst [vmem:[#allocation5 + $0x250] sm:$0xff] %v1340_v28  ;;  %1469 = vst [vmem:[#allocation5 + $0x258] sm:$0xff] %v1341_v0 }
 0x3b0   :  { %1474 = vst [vmem:[#allocation5 + $0x280] sm:$0xff] %v1346_v41  ;;  %1475 = vst [vmem:[#allocation5 + $0x288] sm:$0xff] %v1347_v56  ;;  %v1160_v20 = vpop.permute.xlu1 %1159  ;;  %v1175_v21 = vpop.permute.xlu0 %1174 }
 0x3b1   :  { %v1344_v43 = vmul.f32 %v1681_v54, %v1160_v20  ;;  %v1345_v23 = vmul.f32 %v1682_v14, %v1160_v20  ;;  %v1350_v53 = vmul.f32 %v1683_v27, %v1175_v21  ;;  %v1351_v5 = vmul.f32 %v1684_v60, %v1175_v21  ;;  %v1706_v20 = vld [vmem:[#allocation2 + $0x338] sm:$0xff]  ;;  %v1707_v54 = vld [vmem:[#allocation2 + $0x360] sm:$0xff]  ;;  %v1708_v14 = vld [vmem:[#allocation2 + $0x368] sm:$0xff] }
 0x3b2   :  { %v1709_v60 = vld [vmem:[#allocation2 + $0x350] sm:$0xff] }
 0x3b3   :  { %1472 = vst [vmem:[#allocation5 + $0x270] sm:$0xff] %v1344_v43  ;;  %1473 = vst [vmem:[#allocation5 + $0x278] sm:$0xff] %v1345_v23 }
 0x3b4   :  { %1478 = vst [vmem:[#allocation5 + $0x2a0] sm:$0xff] %v1350_v53  ;;  %1479 = vst [vmem:[#allocation5 + $0x2a8] sm:$0xff] %v1351_v5  ;;  %v1171_v31 = vpop.permute.xlu1 %1170  ;;  %v1183_v1 = vpop.permute.xlu0 %1182 }
 0x3b5   :  { %v1348_v32 = vmul.f32 %v1685_v24, %v1171_v31  ;;  %v1349_v9 = vmul.f32 %v1686_v33, %v1171_v31  ;;  %v1354_v25 = vmul.f32 %v1687_v2, %v1183_v1  ;;  %v1355_v48 = vmul.f32 %v1688_v62, %v1183_v1  ;;  %v1710_v31 = vld [vmem:[#allocation2 + $0x358] sm:$0xff]  ;;  %v1711_v24 = vld [vmem:[#allocation2 + $0x380] sm:$0xff]  ;;  %v1712_v33 = vld [vmem:[#allocation2 + $0x388] sm:$0xff] }
 0x3b6   :  { %v1713_v62 = vld [vmem:[#allocation2 + $0x370] sm:$0xff] }
 0x3b7   :  { %1476 = vst [vmem:[#allocation5 + $0x290] sm:$0xff] %v1348_v32  ;;  %1477 = vst [vmem:[#allocation5 + $0x298] sm:$0xff] %v1349_v9 }
 0x3b8   :  { %1482 = vst [vmem:[#allocation5 + $0x2c0] sm:$0xff] %v1354_v25  ;;  %1483 = vst [vmem:[#allocation5 + $0x2c8] sm:$0xff] %v1355_v48  ;;  %v1179_v3 = vpop.permute.xlu1 %1178  ;;  %v1191_v63 = vpop.permute.xlu0 %1190 }
 0x3b9   :  { %v1352_v49 = vmul.f32 %v1689_v22, %v1179_v3  ;;  %v1353_v34 = vmul.f32 %v1690_v30, %v1179_v3  ;;  %v1358_v26 = vmul.f32 %v1691_v29, %v1191_v63  ;;  %v1359_v10 = vmul.f32 %v1692_v7, %v1191_v63  ;;  %v1714_v3 = vld [vmem:[#allocation2 + $0x378] sm:$0xff]  ;;  %v1715_v22 = vld [vmem:[#allocation2 + $0x3a0] sm:$0xff]  ;;  %v1716_v30 = vld [vmem:[#allocation2 + $0x3a8] sm:$0xff] }
 0x3ba   :  { %v1717_v7 = vld [vmem:[#allocation2 + $0x390] sm:$0xff] }
 0x3bb   :  { %1480 = vst [vmem:[#allocation5 + $0x2b0] sm:$0xff] %v1352_v49  ;;  %1481 = vst [vmem:[#allocation5 + $0x2b8] sm:$0xff] %v1353_v34 }
 0x3bc   :  { %1486 = vst [vmem:[#allocation5 + $0x2e0] sm:$0xff] %v1358_v26  ;;  %1487 = vst [vmem:[#allocation5 + $0x2e8] sm:$0xff] %v1359_v10  ;;  %v1187_v4 = vpop.permute.xlu1 %1186  ;;  %v1202_v11 = vpop.permute.xlu0 %1201 }
 0x3bd   :  { %v1356_v61 = vmul.f32 %v1693_v35, %v1187_v4  ;;  %v1357_v36 = vmul.f32 %v1694_v44, %v1187_v4  ;;  %v1362_v46 = vmul.f32 %v1695_v45, %v1202_v11  ;;  %v1363_v37 = vmul.f32 %v1696_v12, %v1202_v11  ;;  %v1718_v4 = vld [vmem:[#allocation2 + $0x398] sm:$0xff]  ;;  %v1719_v35 = vld [vmem:[#allocation2 + $0x3c0] sm:$0xff]  ;;  %v1720_v44 = vld [vmem:[#allocation2 + $0x3c8] sm:$0xff] }
 0x3be   :  { %v1721_v12 = vld [vmem:[#allocation2 + $0x3b0] sm:$0xff] }
 0x3bf   :  { %1484 = vst [vmem:[#allocation5 + $0x2d0] sm:$0xff] %v1356_v61  ;;  %1485 = vst [vmem:[#allocation5 + $0x2d8] sm:$0xff] %v1357_v36 }
 0x3c0   :  { %1490 = vst [vmem:[#allocation5 + $0x300] sm:$0xff] %v1362_v46  ;;  %1491 = vst [vmem:[#allocation5 + $0x308] sm:$0xff] %v1363_v37  ;;  %v1195_v50 = vpop.permute.xlu1 %1194  ;;  %v1210_v38 = vpop.permute.xlu0 %1209 }
 0x3c1   :  { %v1360_v42 = vmul.f32 %v1697_v13, %v1195_v50  ;;  %v1361_v47 = vmul.f32 %v1698_v39, %v1195_v50  ;;  %v1366_v16 = vmul.f32 %v1699_v15, %v1210_v38  ;;  %v1367_v52 = vmul.f32 %v1700_v58, %v1210_v38  ;;  %v1722_v50 = vld [vmem:[#allocation2 + $0x3b8] sm:$0xff]  ;;  %v1723_v13 = vld [vmem:[#allocation2 + $0x3e0] sm:$0xff]  ;;  %v1724_v39 = vld [vmem:[#allocation2 + $0x3e8] sm:$0xff] }
 0x3c3   :  { %1488 = vst [vmem:[#allocation5 + $0x2f0] sm:$0xff] %v1360_v42  ;;  %1489 = vst [vmem:[#allocation5 + $0x2f8] sm:$0xff] %v1361_v47 }
 0x3c4   :  { %1494 = vst [vmem:[#allocation5 + $0x320] sm:$0xff] %v1366_v16  ;;  %1495 = vst [vmem:[#allocation5 + $0x328] sm:$0xff] %v1367_v52  ;;  %v1206_v40 = vpop.permute.xlu1 %1205  ;;  %v1218_v17 = vpop.permute.xlu0 %1217  ;;  %v1725_v16 = vld [vmem:[#allocation2 + $0x3d0] sm:$0xff]  ;;  %v1726_v52 = vld [vmem:[#allocation2 + $0x3d8] sm:$0xff] }
 0x3c5   :  { %v1364_v51 = vmul.f32 %v1701_v55, %v1206_v40  ;;  %v1365_v8 = vmul.f32 %v1702_v57, %v1206_v40  ;;  %v1370_v28 = vmul.f32 %v1703_v18, %v1218_v17  ;;  %v1371_v0 = vmul.f32 %v1704_v59, %v1218_v17  ;;  %v1727_v55 = vld [vmem:[#allocation2 + $0x3f0] sm:$0xff]  ;;  %v1728_v57 = vld [vmem:[#allocation2 + $0x3f8] sm:$0xff] }
 0x3c7   :  { %1492 = vst [vmem:[#allocation5 + $0x310] sm:$0xff] %v1364_v51  ;;  %1493 = vst [vmem:[#allocation5 + $0x318] sm:$0xff] %v1365_v8 }
 0x3c8   :  { %1498 = vst [vmem:[#allocation5 + $0x340] sm:$0xff] %v1370_v28  ;;  %1499 = vst [vmem:[#allocation5 + $0x348] sm:$0xff] %v1371_v0  ;;  %v1214_v6 = vpop.permute.xlu1 %1213  ;;  %v1226_v41 = vpop.permute.xlu0 %1225 }
 0x3c9   :  { %v1368_v56 = vmul.f32 %v1705_v19, %v1214_v6  ;;  %v1369_v21 = vmul.f32 %v1706_v20, %v1214_v6  ;;  %v1374_v43 = vmul.f32 %v1707_v54, %v1226_v41  ;;  %v1375_v23 = vmul.f32 %v1708_v14, %v1226_v41 }
 0x3cb   :  { %1496 = vst [vmem:[#allocation5 + $0x330] sm:$0xff] %v1368_v56  ;;  %1497 = vst [vmem:[#allocation5 + $0x338] sm:$0xff] %v1369_v21 }
 0x3cc   :  { %1502 = vst [vmem:[#allocation5 + $0x360] sm:$0xff] %v1374_v43  ;;  %1503 = vst [vmem:[#allocation5 + $0x368] sm:$0xff] %v1375_v23  ;;  %v1222_v27 = vpop.permute.xlu1 %1221  ;;  %v1237_v53 = vpop.permute.xlu0 %1236 }
 0x3cd   :  { %v1372_v5 = vmul.f32 %v1709_v60, %v1222_v27  ;;  %v1373_v1 = vmul.f32 %v1710_v31, %v1222_v27  ;;  %v1378_v32 = vmul.f32 %v1711_v24, %v1237_v53  ;;  %v1379_v9 = vmul.f32 %v1712_v33, %v1237_v53 }
 0x3cf   :  { %1500 = vst [vmem:[#allocation5 + $0x350] sm:$0xff] %v1372_v5  ;;  %1501 = vst [vmem:[#allocation5 + $0x358] sm:$0xff] %v1373_v1 }
 0x3d0   :  { %1506 = vst [vmem:[#allocation5 + $0x380] sm:$0xff] %v1378_v32  ;;  %1507 = vst [vmem:[#allocation5 + $0x388] sm:$0xff] %v1379_v9  ;;  %v1230_v2 = vpop.permute.xlu1 %1229  ;;  %v1245_v25 = vpop.permute.xlu0 %1244 }
 0x3d1   :  { %v1376_v48 = vmul.f32 %v1713_v62, %v1230_v2  ;;  %v1377_v63 = vmul.f32 %v1714_v3, %v1230_v2  ;;  %v1382_v49 = vmul.f32 %v1715_v22, %v1245_v25  ;;  %v1383_v34 = vmul.f32 %v1716_v30, %v1245_v25 }
 0x3d3   :  { %1504 = vst [vmem:[#allocation5 + $0x370] sm:$0xff] %v1376_v48  ;;  %1505 = vst [vmem:[#allocation5 + $0x378] sm:$0xff] %v1377_v63 }
 0x3d4   :  { %1510 = vst [vmem:[#allocation5 + $0x3a0] sm:$0xff] %v1382_v49  ;;  %1511 = vst [vmem:[#allocation5 + $0x3a8] sm:$0xff] %v1383_v34  ;;  %v1241_v29 = vpop.permute.xlu1 %1240  ;;  %v1253_v26 = vpop.permute.xlu0 %1252 }
 0x3d5   :  { %v1380_v10 = vmul.f32 %v1717_v7, %v1241_v29  ;;  %v1381_v11 = vmul.f32 %v1718_v4, %v1241_v29  ;;  %v1386_v61 = vmul.f32 %v1719_v35, %v1253_v26  ;;  %v1387_v36 = vmul.f32 %v1720_v44, %v1253_v26 }
 0x3d7   :  { %1508 = vst [vmem:[#allocation5 + $0x390] sm:$0xff] %v1380_v10  ;;  %1509 = vst [vmem:[#allocation5 + $0x398] sm:$0xff] %v1381_v11 }
 0x3d8   :  { %1514 = vst [vmem:[#allocation5 + $0x3c0] sm:$0xff] %v1386_v61  ;;  %1515 = vst [vmem:[#allocation5 + $0x3c8] sm:$0xff] %v1387_v36  ;;  %v1249_v45 = vpop.permute.xlu1 %1248  ;;  %v1261_v46 = vpop.permute.xlu0 %1260 }
 0x3d9   :  { %v1384_v37 = vmul.f32 %v1721_v12, %v1249_v45  ;;  %v1385_v38 = vmul.f32 %v1722_v50, %v1249_v45  ;;  %v1390_v42 = vmul.f32 %v1723_v13, %v1261_v46  ;;  %v1391_v47 = vmul.f32 %v1724_v39, %v1261_v46 }
 0x3db   :  { %1512 = vst [vmem:[#allocation5 + $0x3b0] sm:$0xff] %v1384_v37  ;;  %1513 = vst [vmem:[#allocation5 + $0x3b8] sm:$0xff] %v1385_v38 }
 0x3dc   :  { %1518 = vst [vmem:[#allocation5 + $0x3e0] sm:$0xff] %v1390_v42  ;;  %1519 = vst [vmem:[#allocation5 + $0x3e8] sm:$0xff] %v1391_v47  ;;  %v1257_v15 = vpop.permute.xlu1 %1256 }
 0x3dd   :  { %v1388_v58 = vmul.f32 %v1725_v16, %v1257_v15  ;;  %v1389_v40 = vmul.f32 %v1726_v52, %v1257_v15 }
 0x3df   :  { %1516 = vst [vmem:[#allocation5 + $0x3d0] sm:$0xff] %v1388_v58  ;;  %1517 = vst [vmem:[#allocation5 + $0x3d8] sm:$0xff] %v1389_v40 }
 0x3e0   :  { %v1265_v17 = vpop.permute.xlu1 %1264 }
 0x3e1   :  { %v1392_v51 = vmul.f32 %v1727_v55, %v1265_v17  ;;  %v1393_v8 = vmul.f32 %v1728_v57, %v1265_v17 }
 0x3e3   :  { %1520 = vst [vmem:[#allocation5 + $0x3f0] sm:$0xff] %v1392_v51  ;;  %1521 = vst [vmem:[#allocation5 + $0x3f8] sm:$0xff] %v1393_v8 }
 0x3e4   :  { %1762 = shalt.err (!%p1759_p12)
}
 0x3e5   :  { %s1763_s19 = scalar_lea.hbm %s2163_s3, 16384 }
 0x3e6   :  { %p1764_p13 = scmp.ne.s32.totalorder %s2163_s3, %s1763_s19  ;;  %p1767_p0 = scmp.lt.u32.totalorder %s1763_s19, %s2163_s3 }
 0x3e8   :  { %p1769_p1 = pnand %p1767_p0, %p1764_p13 }
 0x3ea   :  { %1772 = shalt.err (!%p1769_p1)
}
 0x3eb   :  { %1533 = dma.vmem_to_hbm [thread:$0]  %s1528_s15, 16384, %s2163_s3, [#allocation4], %s1778_s22, %s1778_s22, %s1779_s23  }
 0x3ec   :  { %1775 = dma.done.wait [#allocation4], 16384  }
 0x3ed   :  { %1776 = vsyncadd [#allocation4], 4294950912 }
 0x3ee   :  { %1537 = vsyncpa [#allocation3], 1 }
 0x3ef   :  { %1538 = vsyncpa [#allocation4], 1 }

</bundles_post_ra>
